<compile_context>
chip_gen: v7x
topology: tpu7x:2x2x1
jax: 0.10.0
libtpu: 0.0.40
codegen_flags: <defaults>
</compile_context>

<pallas_src>
import functools

import jax
import jax.numpy as jnp
from jax.experimental import pallas as pl
from jax.experimental.pallas import tpu as pltpu

_EPS = 1e-5
_LANES = 128


def _round_up(v, m):
    return (v + m - 1) // m * m


def _pick_tile_h(h, w):
    """Tile height: a divisor of h targeting >=512 output rows per tile."""
    divs = [d for d in range(1, h + 1) if h % d == 0]
    big = [d for d in divs if d * w >= 512]
    if big:
        return min(big)
    mid = [d for d in divs if d * w >= 128 and d < h]
    if mid:
        return min(mid)
    return h


# ----------------------------------------------------------------------------
# Kernel A: 3x3 conv (9 shifted MXU matmuls) + per-tile BN partial statistics
# ----------------------------------------------------------------------------
def _conv_stats_kernel(th, w_out, x_ref, xh0_ref, xh1_ref, w_ref,
                       y_ref, sum_ref, sq_ref):
    # x_ref:   (1, TH, W_arr, Cp)   main rows of the spatially padded input
    # xh0/xh1: (1, 1,  W_arr, Cp)   the 2 halo rows below the tile
    # w_ref:   (9, Cp, Cp)          resident tap weights
    # y_ref:   (1, TH*W, Cp)        pre-BN conv output (f32)
    # sum/sq:  (1, 1, 8, Cp)        per-tile per-channel sum / sum-of-squares
    cp_out = w_ref.shape[-1]
    xl = jnp.concatenate([x_ref[0], xh0_ref[0], xh1_ref[0]], axis=0)  # (TH+2, W_arr, Cp)

    acc = jnp.zeros((th * w_out, cp_out), jnp.float32)
    for dh in range(3):
        for dw in range(3):
            patch = xl[dh:dh + th, dw:dw + w_out, :]
            patch = patch.reshape(th * w_out, xl.shape[-1])
            acc = acc + jnp.dot(patch, w_ref[dh * 3 + dw],
                                preferred_element_type=jnp.float32)

    y_ref[0] = acc
    s = jnp.sum(acc, axis=0, keepdims=True)            # (1, Cp)
    sq = jnp.sum(acc * acc, axis=0, keepdims=True)     # (1, Cp)
    sum_ref[0, 0] = jnp.broadcast_to(s, (8, cp_out))
    sq_ref[0, 0] = jnp.broadcast_to(sq, (8, cp_out))


def _conv3x3_stats(xp, w9, n, t, th, w_out, w_arr, cp):
    rt = th * w_out
    kernel = functools.partial(_conv_stats_kernel, th, w_out)
    return pl.pallas_call(
        kernel,
        grid=(n, t),
        in_specs=[
            pl.BlockSpec((1, th, w_arr, cp), lambda i, j: (i, j, 0, 0)),
            pl.BlockSpec((1, 1, w_arr, cp), lambda i, j: (i, (j + 1) * th, 0, 0)),
            pl.BlockSpec((1, 1, w_arr, cp), lambda i, j: (i, (j + 1) * th + 1, 0, 0)),
            pl.BlockSpec((9, cp, cp), lambda i, j: (0, 0, 0)),      # resident weights
        ],
        out_specs=(
            pl.BlockSpec((1, rt, cp), lambda i, j: (i * t + j, 0, 0)),
            pl.BlockSpec((1, 1, 8, cp), lambda i, j: (i, j, 0, 0)),
            pl.BlockSpec((1, 1, 8, cp), lambda i, j: (i, j, 0, 0)),
        ),
        out_shape=(
            jax.ShapeDtypeStruct((n * t, rt, cp), jnp.float32),
            jax.ShapeDtypeStruct((n, t, 8, cp), jnp.float32),
            jax.ShapeDtypeStruct((n, t, 8, cp), jnp.float32),
        ),
        compiler_params=pltpu.CompilerParams(
            dimension_semantics=("parallel", "parallel"),
            vmem_limit_bytes=32 * 1024 * 1024,
        ),
    )(xp, xp, xp, w9)


# ----------------------------------------------------------------------------
# Kernel B: fused  y*scale + shift  (+ residual)  -> ReLU
# ----------------------------------------------------------------------------
def _bn_act_kernel(has_residual, *refs):
    if has_residual:
        y_ref, sc_ref, sh_ref, r_ref, o_ref = refs
    else:
        y_ref, sc_ref, sh_ref, o_ref = refs
    y = y_ref[0] * sc_ref[...] + sh_ref[...]
    if has_residual:
        y = y + r_ref[0]
    y = jnp.maximum(y, 0.0)
    o_ref[0] = y.astype(o_ref.dtype)


def _bn_act(y, scale, shift, residual=None, out_dtype=jnp.float32):
    nt, rt, cp = y.shape
    inputs = [y, scale, shift]
    in_specs = [
        pl.BlockSpec((1, rt, cp), lambda i: (i, 0, 0)),
        pl.BlockSpec((1, cp), lambda i: (0, 0)),     # resident scale
        pl.BlockSpec((1, cp), lambda i: (0, 0)),     # resident shift
    ]
    if residual is not None:
        inputs.append(residual)
        in_specs.append(pl.BlockSpec((1, rt, cp), lambda i: (i, 0, 0)))
    kernel = functools.partial(_bn_act_kernel, residual is not None)
    return pl.pallas_call(
        kernel,
        grid=(nt,),
        in_specs=in_specs,
        out_specs=pl.BlockSpec((1, rt, cp), lambda i: (i, 0, 0)),
        out_shape=jax.ShapeDtypeStruct((nt, rt, cp), out_dtype),
        compiler_params=pltpu.CompilerParams(
            dimension_semantics=("parallel",),
            vmem_limit_bytes=32 * 1024 * 1024,
        ),
    )(*inputs)


# ----------------------------------------------------------------------------
# Tiny JAX glue: fold per-tile partials into per-channel scale / shift
# ----------------------------------------------------------------------------
def _bn_affine(sum_part, sq_part, count, gamma_p, beta_p):
    s = jnp.sum(sum_part[:, :, 0, :], axis=(0, 1))
    sq = jnp.sum(sq_part[:, :, 0, :], axis=(0, 1))
    mean = s / count
    var = jnp.maximum(sq / count - mean * mean, 0.0)
    inv = jax.lax.rsqrt(var + _EPS)
    scale = gamma_p * inv
    shift = beta_p - mean * scale
    return scale.reshape(1, -1).astype(jnp.float32), shift.reshape(1, -1).astype(jnp.float32)


# ----------------------------------------------------------------------------
# Full forward pass
# ----------------------------------------------------------------------------
def residual_block_forward(x_nchw, conv1_w, bn1_gamma, bn1_beta, *,
                           compute_dtype=jnp.float32):
    """Pallas implementation of ResidualBlock.forward (inplanes==planes, stride==1)."""
    x = jnp.transpose(x_nchw, (0, 2, 3, 1)).astype(jnp.float32)   # NCHW -> NHWC
    n, h, w, c = x.shape
    cout = conv1_w.shape[0]
    assert cout == c, "runnable configuration requires inplanes == planes (g = x)"
    cp = _round_up(cout, _LANES)

    th = _pick_tile_h(h, w)
    t = h // th
    rt = th * w
    w_arr = _round_up(w + 2, 8)
    hp = h + max(2, th)

    def spatial_pad(img):
        # conv 'same' padding (+1 top/left) plus alignment zeros bottom/right
        return jnp.pad(img, ((0, 0), (1, hp - h - 1), (1, w_arr - w - 1), (0, 0)))

    # channel-padded NHWC x (f32) -> residual stream (free reshape into tiles)
    x_cpad = jnp.pad(x, ((0, 0), (0, 0), (0, 0), (0, cp - c)))
    res_rows = x_cpad.reshape(n * t, rt, cp)
    xp = spatial_pad(x_cpad).astype(compute_dtype)

    # (Cout, Cin, 3, 3) -> (9, Cin_p, Cout_p), padded; gamma/beta padded with 0
    w9 = jnp.transpose(conv1_w, (2, 3, 1, 0)).reshape(9, c, cout)
    w9 = jnp.pad(w9, ((0, 0), (0, cp - c), (0, cp - cout))).astype(compute_dtype)
    gamma_p = jnp.pad(bn1_gamma.astype(jnp.float32), (0, cp - cout))
    beta_p = jnp.pad(bn1_beta.astype(jnp.float32), (0, cp - cout))
    count = float(n * h * w)

    # ---- pass 1:  f = relu(BN1(conv1(x))) ----
    y1, s1, q1 = _conv3x3_stats(xp, w9, n, t, th, w, w_arr, cp)
    sc1, sh1 = _bn_affine(s1, q1, count, gamma_p, beta_p)
    f1 = _bn_act(y1, sc1, sh1, residual=None, out_dtype=compute_dtype)

    # ---- pass 2:  f = BN1(conv1(f));  out = relu(f + x) ----
    f1p = spatial_pad(f1.reshape(n, h, w, cp))        # already channel-padded
    y2, s2, q2 = _conv3x3_stats(f1p, w9, n, t, th, w, w_arr, cp)
    sc2, sh2 = _bn_affine(s2, q2, count, gamma_p, beta_p)
    out = _bn_act(y2, sc2, sh2, residual=res_rows, out_dtype=jnp.float32)

    out_img = out.reshape(n, h, w, cp)[:, :, :, :cout]
    return jnp.transpose(out_img, (0, 3, 1, 2))       # back to NCHW
    # TODO(synk): conv2/batch_norm2 and the convg/batch_normg shortcut branch
    # are unreachable (dead code) in any runnable configuration of the module
    # and are not lowered.


# ----------------------------------------------------------------------------
# Pure-JAX reference for validation
# ----------------------------------------------------------------------------
def _ref_forward(x, w1, gamma, beta):
    def conv(inp):
        return jax.lax.conv_general_dilated(
            inp, w1, (1, 1), ((1, 1), (1, 1)),
            dimension_numbers=("NCHW", "OIHW", "NCHW"))

    def bn(y):
        mean = jnp.mean(y, axis=(0, 2, 3), keepdims=True)
        var = jnp.mean(jnp.square(y - mean), axis=(0, 2, 3), keepdims=True)
        yhat = (y - mean) * jax.lax.rsqrt(var + _EPS)
        return yhat * gamma.reshape(1, -1, 1, 1) + beta.reshape(1, -1, 1, 1)

    f = jax.nn.relu(bn(conv(x)))
    f = bn(conv(f))
    return jax.nn.relu(f + x)


# ----------------------------------------------------------------------------
if __name__ == "__main__":
    N, C, H, W = 2, 4, 16, 16          # inplanes = planes = 4, stride = 1
    key = jax.random.PRNGKey(0)
    kx, kw = jax.random.split(key)

    x = jax.random.normal(kx, (N, C, H, W), dtype=jnp.float32)
    conv1_w = 0.1 * jax.random.normal(kw, (C, C, 3, 3), dtype=jnp.float32)
    bn1_gamma = jnp.ones((C,), dtype=jnp.float32)    # PyTorch BN default init
    bn1_beta = jnp.zeros((C,), dtype=jnp.float32)

    ref = _ref_forward(x, conv1_w, bn1_gamma, bn1_beta)

    # f32 MXU path: tight check against the reference.
    fwd_f32 = jax.jit(functools.partial(residual_block_forward,
                                        compute_dtype=jnp.float32))
    out = jax.block_until_ready(fwd_f32(x, conv1_w, bn1_gamma, bn1_beta))
    assert out.shape == (N, C, H, W)
    assert jnp.allclose(out, ref, atol=5e-4, rtol=5e-4), "f32 mismatch vs reference"

    # bf16 MXU fast path (v6e/v7x): loose check.
    fwd_bf16 = jax.jit(functools.partial(residual_block_forward,
                                         compute_dtype=jnp.bfloat16))
    out_bf16 = jax.block_until_ready(fwd_bf16(x, conv1_w, bn1_gamma, bn1_beta))
    assert out_bf16.shape == (N, C, H, W)
    assert jnp.allclose(out_bf16, ref, atol=1e-1, rtol=1e-1), "bf16 mismatch vs reference"

    print("KERNEL_OK")
</pallas_src>

<mosaic_0001>
module attributes {stable_mosaic.version = 11 : i64} {
  func.func @_conv_stats_kernel(%arg0: i32, %arg1: i32, %arg2: memref<1x8x24x128xf32, #tpu.memory_space<vmem>>, %arg3: memref<1x1x24x128xf32, #tpu.memory_space<vmem>>, %arg4: memref<1x1x24x128xf32, #tpu.memory_space<vmem>>, %arg5: memref<9x128x128xf32, #tpu.memory_space<vmem>>, %arg6: memref<1x128x128xf32, #tpu.memory_space<vmem>>, %arg7: memref<1x1x8x128xf32, #tpu.memory_space<vmem>>, %arg8: memref<1x1x8x128xf32, #tpu.memory_space<vmem>>) attributes {dimension_semantics = [#tpu.dimension_semantics<parallel>, #tpu.dimension_semantics<parallel>], iteration_bounds = array<i64: 2, 2>, scalar_prefetch = 0 : i64, scratch_operands = 0 : i64, tpu.core_type = #tpu.core_type<tc>, window_params = [{transform_indices = @transform_0, window_bounds = array<i64: 1, 8, 24, 128>}, {transform_indices = @transform_1, window_bounds = array<i64: 1, 1, 24, 128>}, {transform_indices = @transform_2, window_bounds = array<i64: 1, 1, 24, 128>}, {pipeline_mode = #tpu.pipeline_mode<synchronous>, transform_indices = @transform_3, window_bounds = array<i64: 9, 128, 128>}, {transform_indices = @transform_4, window_bounds = array<i64: 1, 128, 128>}, {transform_indices = @transform_5, window_bounds = array<i64: 1, 1, 8, 128>}, {transform_indices = @transform_6, window_bounds = array<i64: 1, 1, 8, 128>}]} {
    %c0 = arith.constant 0 : index
    %c0_0 = arith.constant 0 : index
    %c0_1 = arith.constant 0 : index
    %c0_2 = arith.constant 0 : index
    %0 = vector.load %arg2[%c0, %c0_0, %c0_1, %c0_2] : memref<1x8x24x128xf32, #tpu.memory_space<vmem>>, vector<1x8x24x128xf32>
    %1 = vector.shape_cast %0 : vector<1x8x24x128xf32> to vector<8x24x128xf32>
    %c0_3 = arith.constant 0 : index
    %c0_4 = arith.constant 0 : index
    %c0_5 = arith.constant 0 : index
    %c0_6 = arith.constant 0 : index
    %2 = vector.load %arg3[%c0_3, %c0_4, %c0_5, %c0_6] : memref<1x1x24x128xf32, #tpu.memory_space<vmem>>, vector<1x1x24x128xf32>
    %3 = vector.shape_cast %2 : vector<1x1x24x128xf32> to vector<1x24x128xf32>
    %c0_7 = arith.constant 0 : index
    %c0_8 = arith.constant 0 : index
    %c0_9 = arith.constant 0 : index
    %c0_10 = arith.constant 0 : index
    %4 = vector.load %arg4[%c0_7, %c0_8, %c0_9, %c0_10] : memref<1x1x24x128xf32, #tpu.memory_space<vmem>>, vector<1x1x24x128xf32>
    %5 = vector.shape_cast %4 : vector<1x1x24x128xf32> to vector<1x24x128xf32>
    %6 = tpu.concatenate %1, %3, %5 in 0 : vector<8x24x128xf32>, vector<1x24x128xf32>, vector<1x24x128xf32> -> vector<10x24x128xf32>
    %cst = arith.constant 0.000000e+00 : f32
    %7 = vector.broadcast %cst : f32 to vector<128x128xf32>
    %8 = vector.extract_strided_slice %6 {offsets = [0, 0, 0], sizes = [8, 16, 128], strides = [1, 1, 1]} : vector<10x24x128xf32> to vector<8x16x128xf32>
    %9 = vector.shape_cast %8 : vector<8x16x128xf32> to vector<128x128xf32>
    %c0_11 = arith.constant 0 : index
    %c0_12 = arith.constant 0 : index
    %c0_13 = arith.constant 0 : index
    %10 = vector.load %arg5[%c0_11, %c0_12, %c0_13] : memref<9x128x128xf32, #tpu.memory_space<vmem>>, vector<1x128x128xf32>
    %11 = vector.shape_cast %10 : vector<1x128x128xf32> to vector<128x128xf32>
    %cst_14 = arith.constant dense<0.000000e+00> : vector<128x128xf32>
    %12 = tpu.matmul %9, %11, %cst_14 {dimension_numbers = #tpu.dot_dimension_numbers<[1], [0], [0], [1], [0, 0, 1, 1], [], []>} : vector<128x128xf32>, vector<128x128xf32>, vector<128x128xf32> -> vector<128x128xf32>
    %13 = arith.addf %7, %12 : vector<128x128xf32>
    %14 = vector.extract_strided_slice %6 {offsets = [0, 1, 0], sizes = [8, 16, 128], strides = [1, 1, 1]} : vector<10x24x128xf32> to vector<8x16x128xf32>
    %15 = vector.shape_cast %14 : vector<8x16x128xf32> to vector<128x128xf32>
    %c1 = arith.constant 1 : index
    %c0_15 = arith.constant 0 : index
    %c0_16 = arith.constant 0 : index
    %16 = vector.load %arg5[%c1, %c0_15, %c0_16] : memref<9x128x128xf32, #tpu.memory_space<vmem>>, vector<1x128x128xf32>
    %17 = vector.shape_cast %16 : vector<1x128x128xf32> to vector<128x128xf32>
    %cst_17 = arith.constant dense<0.000000e+00> : vector<128x128xf32>
    %18 = tpu.matmul %15, %17, %cst_17 {dimension_numbers = #tpu.dot_dimension_numbers<[1], [0], [0], [1], [0, 0, 1, 1], [], []>} : vector<128x128xf32>, vector<128x128xf32>, vector<128x128xf32> -> vector<128x128xf32>
    %19 = arith.addf %13, %18 : vector<128x128xf32>
    %20 = vector.extract_strided_slice %6 {offsets = [0, 2, 0], sizes = [8, 16, 128], strides = [1, 1, 1]} : vector<10x24x128xf32> to vector<8x16x128xf32>
    %21 = vector.shape_cast %20 : vector<8x16x128xf32> to vector<128x128xf32>
    %c2 = arith.constant 2 : index
    %c0_18 = arith.constant 0 : index
    %c0_19 = arith.constant 0 : index
    %22 = vector.load %arg5[%c2, %c0_18, %c0_19] : memref<9x128x128xf32, #tpu.memory_space<vmem>>, vector<1x128x128xf32>
    %23 = vector.shape_cast %22 : vector<1x128x128xf32> to vector<128x128xf32>
    %cst_20 = arith.constant dense<0.000000e+00> : vector<128x128xf32>
    %24 = tpu.matmul %21, %23, %cst_20 {dimension_numbers = #tpu.dot_dimension_numbers<[1], [0], [0], [1], [0, 0, 1, 1], [], []>} : vector<128x128xf32>, vector<128x128xf32>, vector<128x128xf32> -> vector<128x128xf32>
    %25 = arith.addf %19, %24 : vector<128x128xf32>
    %26 = vector.extract_strided_slice %6 {offsets = [1, 0, 0], sizes = [8, 16, 128], strides = [1, 1, 1]} : vector<10x24x128xf32> to vector<8x16x128xf32>
    %27 = vector.shape_cast %26 : vector<8x16x128xf32> to vector<128x128xf32>
    %c3 = arith.constant 3 : index
    %c0_21 = arith.constant 0 : index
    %c0_22 = arith.constant 0 : index
    %28 = vector.load %arg5[%c3, %c0_21, %c0_22] : memref<9x128x128xf32, #tpu.memory_space<vmem>>, vector<1x128x128xf32>
    %29 = vector.shape_cast %28 : vector<1x128x128xf32> to vector<128x128xf32>
    %cst_23 = arith.constant dense<0.000000e+00> : vector<128x128xf32>
    %30 = tpu.matmul %27, %29, %cst_23 {dimension_numbers = #tpu.dot_dimension_numbers<[1], [0], [0], [1], [0, 0, 1, 1], [], []>} : vector<128x128xf32>, vector<128x128xf32>, vector<128x128xf32> -> vector<128x128xf32>
    %31 = arith.addf %25, %30 : vector<128x128xf32>
    %32 = vector.extract_strided_slice %6 {offsets = [1, 1, 0], sizes = [8, 16, 128], strides = [1, 1, 1]} : vector<10x24x128xf32> to vector<8x16x128xf32>
    %33 = vector.shape_cast %32 : vector<8x16x128xf32> to vector<128x128xf32>
    %c4 = arith.constant 4 : index
    %c0_24 = arith.constant 0 : index
    %c0_25 = arith.constant 0 : index
    %34 = vector.load %arg5[%c4, %c0_24, %c0_25] : memref<9x128x128xf32, #tpu.memory_space<vmem>>, vector<1x128x128xf32>
    %35 = vector.shape_cast %34 : vector<1x128x128xf32> to vector<128x128xf32>
    %cst_26 = arith.constant dense<0.000000e+00> : vector<128x128xf32>
    %36 = tpu.matmul %33, %35, %cst_26 {dimension_numbers = #tpu.dot_dimension_numbers<[1], [0], [0], [1], [0, 0, 1, 1], [], []>} : vector<128x128xf32>, vector<128x128xf32>, vector<128x128xf32> -> vector<128x128xf32>
    %37 = arith.addf %31, %36 : vector<128x128xf32>
    %38 = vector.extract_strided_slice %6 {offsets = [1, 2, 0], sizes = [8, 16, 128], strides = [1, 1, 1]} : vector<10x24x128xf32> to vector<8x16x128xf32>
    %39 = vector.shape_cast %38 : vector<8x16x128xf32> to vector<128x128xf32>
    %c5 = arith.constant 5 : index
    %c0_27 = arith.constant 0 : index
    %c0_28 = arith.constant 0 : index
    %40 = vector.load %arg5[%c5, %c0_27, %c0_28] : memref<9x128x128xf32, #tpu.memory_space<vmem>>, vector<1x128x128xf32>
    %41 = vector.shape_cast %40 : vector<1x128x128xf32> to vector<128x128xf32>
    %cst_29 = arith.constant dense<0.000000e+00> : vector<128x128xf32>
    %42 = tpu.matmul %39, %41, %cst_29 {dimension_numbers = #tpu.dot_dimension_numbers<[1], [0], [0], [1], [0, 0, 1, 1], [], []>} : vector<128x128xf32>, vector<128x128xf32>, vector<128x128xf32> -> vector<128x128xf32>
    %43 = arith.addf %37, %42 : vector<128x128xf32>
    %44 = vector.extract_strided_slice %6 {offsets = [2, 0, 0], sizes = [8, 16, 128], strides = [1, 1, 1]} : vector<10x24x128xf32> to vector<8x16x128xf32>
    %45 = vector.shape_cast %44 : vector<8x16x128xf32> to vector<128x128xf32>
    %c6 = arith.constant 6 : index
    %c0_30 = arith.constant 0 : index
    %c0_31 = arith.constant 0 : index
    %46 = vector.load %arg5[%c6, %c0_30, %c0_31] : memref<9x128x128xf32, #tpu.memory_space<vmem>>, vector<1x128x128xf32>
    %47 = vector.shape_cast %46 : vector<1x128x128xf32> to vector<128x128xf32>
    %cst_32 = arith.constant dense<0.000000e+00> : vector<128x128xf32>
    %48 = tpu.matmul %45, %47, %cst_32 {dimension_numbers = #tpu.dot_dimension_numbers<[1], [0], [0], [1], [0, 0, 1, 1], [], []>} : vector<128x128xf32>, vector<128x128xf32>, vector<128x128xf32> -> vector<128x128xf32>
    %49 = arith.addf %43, %48 : vector<128x128xf32>
    %50 = vector.extract_strided_slice %6 {offsets = [2, 1, 0], sizes = [8, 16, 128], strides = [1, 1, 1]} : vector<10x24x128xf32> to vector<8x16x128xf32>
    %51 = vector.shape_cast %50 : vector<8x16x128xf32> to vector<128x128xf32>
    %c7 = arith.constant 7 : index
    %c0_33 = arith.constant 0 : index
    %c0_34 = arith.constant 0 : index
    %52 = vector.load %arg5[%c7, %c0_33, %c0_34] : memref<9x128x128xf32, #tpu.memory_space<vmem>>, vector<1x128x128xf32>
    %53 = vector.shape_cast %52 : vector<1x128x128xf32> to vector<128x128xf32>
    %cst_35 = arith.constant dense<0.000000e+00> : vector<128x128xf32>
    %54 = tpu.matmul %51, %53, %cst_35 {dimension_numbers = #tpu.dot_dimension_numbers<[1], [0], [0], [1], [0, 0, 1, 1], [], []>} : vector<128x128xf32>, vector<128x128xf32>, vector<128x128xf32> -> vector<128x128xf32>
    %55 = arith.addf %49, %54 : vector<128x128xf32>
    %56 = vector.extract_strided_slice %6 {offsets = [2, 2, 0], sizes = [8, 16, 128], strides = [1, 1, 1]} : vector<10x24x128xf32> to vector<8x16x128xf32>
    %57 = vector.shape_cast %56 : vector<8x16x128xf32> to vector<128x128xf32>
    %c8 = arith.constant 8 : index
    %c0_36 = arith.constant 0 : index
    %c0_37 = arith.constant 0 : index
    %58 = vector.load %arg5[%c8, %c0_36, %c0_37] : memref<9x128x128xf32, #tpu.memory_space<vmem>>, vector<1x128x128xf32>
    %59 = vector.shape_cast %58 : vector<1x128x128xf32> to vector<128x128xf32>
    %cst_38 = arith.constant dense<0.000000e+00> : vector<128x128xf32>
    %60 = tpu.matmul %57, %59, %cst_38 {dimension_numbers = #tpu.dot_dimension_numbers<[1], [0], [0], [1], [0, 0, 1, 1], [], []>} : vector<128x128xf32>, vector<128x128xf32>, vector<128x128xf32> -> vector<128x128xf32>
    %61 = arith.addf %55, %60 : vector<128x128xf32>
    %c0_39 = arith.constant 0 : index
    %c0_40 = arith.constant 0 : index
    %c0_41 = arith.constant 0 : index
    %62 = vector.load %arg6[%c0_39, %c0_40, %c0_41] : memref<1x128x128xf32, #tpu.memory_space<vmem>>, vector<1x128x128xf32>
    %63 = vector.shape_cast %62 : vector<1x128x128xf32> to vector<128x128xf32>
    %64 = vector.shape_cast %61 : vector<128x128xf32> to vector<1x128x128xf32>
    tpu.vector_store %arg6[%c0_39, %c0_40, %c0_41], %64 {strides = array<i32>} : memref<1x128x128xf32, #tpu.memory_space<vmem>>, vector<1x128x128xf32>,
    %cst_42 = arith.constant dense<0.000000e+00> : vector<128xf32>
    %65 = vector.multi_reduction <add>, %61, %cst_42 [0] : vector<128x128xf32> to vector<128xf32>
    %66 = vector.shape_cast %65 : vector<128xf32> to vector<1x128xf32>
    %67 = arith.mulf %61, %61 : vector<128x128xf32>
    %cst_43 = arith.constant dense<0.000000e+00> : vector<128xf32>
    %68 = vector.multi_reduction <add>, %67, %cst_43 [0] : vector<128x128xf32> to vector<128xf32>
    %69 = vector.shape_cast %68 : vector<128xf32> to vector<1x128xf32>
    %70 = vector.shape_cast %66 : vector<1x128xf32> to vector<1x128xf32>
    %71 = vector.broadcast %70 : vector<1x128xf32> to vector<8x128xf32>
    %c0_44 = arith.constant 0 : index
    %c0_45 = arith.constant 0 : index
    %c0_46 = arith.constant 0 : index
    %c0_47 = arith.constant 0 : index
    %72 = vector.load %arg7[%c0_44, %c0_45, %c0_46, %c0_47] : memref<1x1x8x128xf32, #tpu.memory_space<vmem>>, vector<1x1x8x128xf32>
    %73 = vector.shape_cast %72 : vector<1x1x8x128xf32> to vector<8x128xf32>
    %74 = vector.shape_cast %71 : vector<8x128xf32> to vector<1x1x8x128xf32>
    tpu.vector_store %arg7[%c0_44, %c0_45, %c0_46, %c0_47], %74 {strides = array<i32>} : memref<1x1x8x128xf32, #tpu.memory_space<vmem>>, vector<1x1x8x128xf32>,
    %75 = vector.shape_cast %69 : vector<1x128xf32> to vector<1x128xf32>
    %76 = vector.broadcast %75 : vector<1x128xf32> to vector<8x128xf32>
    %c0_48 = arith.constant 0 : index
    %c0_49 = arith.constant 0 : index
    %c0_50 = arith.constant 0 : index
    %c0_51 = arith.constant 0 : index
    %77 = vector.load %arg8[%c0_48, %c0_49, %c0_50, %c0_51] : memref<1x1x8x128xf32, #tpu.memory_space<vmem>>, vector<1x1x8x128xf32>
    %78 = vector.shape_cast %77 : vector<1x1x8x128xf32> to vector<8x128xf32>
    %79 = vector.shape_cast %76 : vector<8x128xf32> to vector<1x1x8x128xf32>
    tpu.vector_store %arg8[%c0_48, %c0_49, %c0_50, %c0_51], %79 {strides = array<i32>} : memref<1x1x8x128xf32, #tpu.memory_space<vmem>>, vector<1x1x8x128xf32>,
    return
  }
  func.func @transform_0(%arg0: i32, %arg1: i32) -> (i32, i32, i32, i32) {
    %c0_i32 = arith.constant 0 : i32
    %c0_i32_0 = arith.constant 0 : i32
    %c0_i32_1 = arith.constant 0 : i32
    return %arg0, %arg1, %c0_i32, %c0_i32_0 : i32, i32, i32, i32
  }
  func.func @transform_1(%arg0: i32, %arg1: i32) -> (i32, i32, i32, i32) {
    %c1_i32 = arith.constant 1 : i32
    %0 = arith.addi %arg1, %c1_i32 : i32
    %c8_i32 = arith.constant 8 : i32
    %1 = arith.muli %0, %c8_i32 : i32
    %c0_i32 = arith.constant 0 : i32
    %c0_i32_0 = arith.constant 0 : i32
    %c0_i32_1 = arith.constant 0 : i32
    return %arg0, %1, %c0_i32, %c0_i32_0 : i32, i32, i32, i32
  }
  func.func @transform_2(%arg0: i32, %arg1: i32) -> (i32, i32, i32, i32) {
    %c1_i32 = arith.constant 1 : i32
    %0 = arith.addi %arg1, %c1_i32 : i32
    %c8_i32 = arith.constant 8 : i32
    %1 = arith.muli %0, %c8_i32 : i32
    %c1_i32_0 = arith.constant 1 : i32
    %2 = arith.addi %1, %c1_i32_0 : i32
    %c0_i32 = arith.constant 0 : i32
    %c0_i32_1 = arith.constant 0 : i32
    %c0_i32_2 = arith.constant 0 : i32
    return %arg0, %2, %c0_i32, %c0_i32_1 : i32, i32, i32, i32
  }
  func.func @transform_3(%arg0: i32, %arg1: i32) -> (i32, i32, i32) {
    %c0_i32 = arith.constant 0 : i32
    %c0_i32_0 = arith.constant 0 : i32
    %c0_i32_1 = arith.constant 0 : i32
    %c0_i32_2 = arith.constant 0 : i32
    return %c0_i32, %c0_i32_0, %c0_i32_1 : i32, i32, i32
  }
  func.func @transform_4(%arg0: i32, %arg1: i32) -> (i32, i32, i32) {
    %c2_i32 = arith.constant 2 : i32
    %0 = arith.muli %arg0, %c2_i32 : i32
    %1 = arith.addi %0, %arg1 : i32
    %c0_i32 = arith.constant 0 : i32
    %c0_i32_0 = arith.constant 0 : i32
    %c0_i32_1 = arith.constant 0 : i32
    return %1, %c0_i32, %c0_i32_0 : i32, i32, i32
  }
  func.func @transform_5(%arg0: i32, %arg1: i32) -> (i32, i32, i32, i32) {
    %c0_i32 = arith.constant 0 : i32
    %c0_i32_0 = arith.constant 0 : i32
    %c0_i32_1 = arith.constant 0 : i32
    return %arg0, %arg1, %c0_i32, %c0_i32_0 : i32, i32, i32, i32
  }
  func.func @transform_6(%arg0: i32, %arg1: i32) -> (i32, i32, i32, i32) {
    %c0_i32 = arith.constant 0 : i32
    %c0_i32_0 = arith.constant 0 : i32
    %c0_i32_1 = arith.constant 0 : i32
    return %arg0, %arg1, %c0_i32, %c0_i32_0 : i32, i32, i32, i32
  }
}

module attributes {stable_mosaic.version = 11 : i64} {
  func.func @_bn_act_kernel(%arg0: i32, %arg1: memref<1x128x128xf32, #tpu.memory_space<vmem>>, %arg2: memref<1x128xf32, #tpu.memory_space<vmem>>, %arg3: memref<1x128xf32, #tpu.memory_space<vmem>>, %arg4: memref<1x128x128xf32, #tpu.memory_space<vmem>>) attributes {dimension_semantics = [#tpu.dimension_semantics<parallel>], iteration_bounds = array<i64: 4>, scalar_prefetch = 0 : i64, scratch_operands = 0 : i64, tpu.core_type = #tpu.core_type<tc>, window_params = [{transform_indices = @transform_0, window_bounds = array<i64: 1, 128, 128>}, {pipeline_mode = #tpu.pipeline_mode<synchronous>, transform_indices = @transform_1, window_bounds = array<i64: 1, 128>}, {pipeline_mode = #tpu.pipeline_mode<synchronous>, transform_indices = @transform_2, window_bounds = array<i64: 1, 128>}, {transform_indices = @transform_3, window_bounds = array<i64: 1, 128, 128>}]} {
    %c0 = arith.constant 0 : index
    %c0_0 = arith.constant 0 : index
    %c0_1 = arith.constant 0 : index
    %0 = vector.load %arg1[%c0, %c0_0, %c0_1] : memref<1x128x128xf32, #tpu.memory_space<vmem>>, vector<1x128x128xf32>
    %1 = vector.shape_cast %0 : vector<1x128x128xf32> to vector<128x128xf32>
    %c0_2 = arith.constant 0 : index
    %c0_3 = arith.constant 0 : index
    %2 = vector.load %arg2[%c0_2, %c0_3] : memref<1x128xf32, #tpu.memory_space<vmem>>, vector<1x128xf32>
    %3 = vector.broadcast %2 : vector<1x128xf32> to vector<128x128xf32>
    %4 = arith.mulf %1, %3 : vector<128x128xf32>
    %c0_4 = arith.constant 0 : index
    %c0_5 = arith.constant 0 : index
    %5 = vector.load %arg3[%c0_4, %c0_5] : memref<1x128xf32, #tpu.memory_space<vmem>>, vector<1x128xf32>
    %6 = vector.broadcast %5 : vector<1x128xf32> to vector<128x128xf32>
    %7 = arith.addf %4, %6 : vector<128x128xf32>
    %cst = arith.constant 0.000000e+00 : f32
    %8 = vector.broadcast %cst : f32 to vector<128x128xf32>
    %9 = arith.maximumf %7, %8 : vector<128x128xf32>
    %c0_6 = arith.constant 0 : index
    %c0_7 = arith.constant 0 : index
    %c0_8 = arith.constant 0 : index
    %10 = vector.load %arg4[%c0_6, %c0_7, %c0_8] : memref<1x128x128xf32, #tpu.memory_space<vmem>>, vector<1x128x128xf32>
    %11 = vector.shape_cast %10 : vector<1x128x128xf32> to vector<128x128xf32>
    %12 = vector.shape_cast %9 : vector<128x128xf32> to vector<1x128x128xf32>
    tpu.vector_store %arg4[%c0_6, %c0_7, %c0_8], %12 {strides = array<i32>} : memref<1x128x128xf32, #tpu.memory_space<vmem>>, vector<1x128x128xf32>,
    return
  }
  func.func @transform_0(%arg0: i32) -> (i32, i32, i32) {
    %c0_i32 = arith.constant 0 : i32
    %c0_i32_0 = arith.constant 0 : i32
    %c0_i32_1 = arith.constant 0 : i32
    return %arg0, %c0_i32, %c0_i32_0 : i32, i32, i32
  }
  func.func @transform_1(%arg0: i32) -> (i32, i32) {
    %c0_i32 = arith.constant 0 : i32
    %c0_i32_0 = arith.constant 0 : i32
    %c0_i32_1 = arith.constant 0 : i32
    return %c0_i32, %c0_i32_0 : i32, i32
  }
  func.func @transform_2(%arg0: i32) -> (i32, i32) {
    %c0_i32 = arith.constant 0 : i32
    %c0_i32_0 = arith.constant 0 : i32
    %c0_i32_1 = arith.constant 0 : i32
    return %c0_i32, %c0_i32_0 : i32, i32
  }
  func.func @transform_3(%arg0: i32) -> (i32, i32, i32) {
    %c0_i32 = arith.constant 0 : i32
    %c0_i32_0 = arith.constant 0 : i32
    %c0_i32_1 = arith.constant 0 : i32
    return %arg0, %c0_i32, %c0_i32_0 : i32, i32, i32
  }
}

module attributes {stable_mosaic.version = 11 : i64} {
  func.func @_bn_act_kernel(%arg0: i32, %arg1: memref<1x128x128xf32, #tpu.memory_space<vmem>>, %arg2: memref<1x128xf32, #tpu.memory_space<vmem>>, %arg3: memref<1x128xf32, #tpu.memory_space<vmem>>, %arg4: memref<1x128x128xf32, #tpu.memory_space<vmem>>, %arg5: memref<1x128x128xf32, #tpu.memory_space<vmem>>) attributes {dimension_semantics = [#tpu.dimension_semantics<parallel>], iteration_bounds = array<i64: 4>, scalar_prefetch = 0 : i64, scratch_operands = 0 : i64, tpu.core_type = #tpu.core_type<tc>, window_params = [{transform_indices = @transform_0, window_bounds = array<i64: 1, 128, 128>}, {pipeline_mode = #tpu.pipeline_mode<synchronous>, transform_indices = @transform_1, window_bounds = array<i64: 1, 128>}, {pipeline_mode = #tpu.pipeline_mode<synchronous>, transform_indices = @transform_2, window_bounds = array<i64: 1, 128>}, {transform_indices = @transform_3, window_bounds = array<i64: 1, 128, 128>}, {transform_indices = @transform_4, window_bounds = array<i64: 1, 128, 128>}]} {
    %c0 = arith.constant 0 : index
    %c0_0 = arith.constant 0 : index
    %c0_1 = arith.constant 0 : index
    %0 = vector.load %arg1[%c0, %c0_0, %c0_1] : memref<1x128x128xf32, #tpu.memory_space<vmem>>, vector<1x128x128xf32>
    %1 = vector.shape_cast %0 : vector<1x128x128xf32> to vector<128x128xf32>
    %c0_2 = arith.constant 0 : index
    %c0_3 = arith.constant 0 : index
    %2 = vector.load %arg2[%c0_2, %c0_3] : memref<1x128xf32, #tpu.memory_space<vmem>>, vector<1x128xf32>
    %3 = vector.broadcast %2 : vector<1x128xf32> to vector<128x128xf32>
    %4 = arith.mulf %1, %3 : vector<128x128xf32>
    %c0_4 = arith.constant 0 : index
    %c0_5 = arith.constant 0 : index
    %5 = vector.load %arg3[%c0_4, %c0_5] : memref<1x128xf32, #tpu.memory_space<vmem>>, vector<1x128xf32>
    %6 = vector.broadcast %5 : vector<1x128xf32> to vector<128x128xf32>
    %7 = arith.addf %4, %6 : vector<128x128xf32>
    %c0_6 = arith.constant 0 : index
    %c0_7 = arith.constant 0 : index
    %c0_8 = arith.constant 0 : index
    %8 = vector.load %arg4[%c0_6, %c0_7, %c0_8] : memref<1x128x128xf32, #tpu.memory_space<vmem>>, vector<1x128x128xf32>
    %9 = vector.shape_cast %8 : vector<1x128x128xf32> to vector<128x128xf32>
    %10 = arith.addf %7, %9 : vector<128x128xf32>
    %cst = arith.constant 0.000000e+00 : f32
    %11 = vector.broadcast %cst : f32 to vector<128x128xf32>
    %12 = arith.maximumf %10, %11 : vector<128x128xf32>
    %c0_9 = arith.constant 0 : index
    %c0_10 = arith.constant 0 : index
    %c0_11 = arith.constant 0 : index
    %13 = vector.load %arg5[%c0_9, %c0_10, %c0_11] : memref<1x128x128xf32, #tpu.memory_space<vmem>>, vector<1x128x128xf32>
    %14 = vector.shape_cast %13 : vector<1x128x128xf32> to vector<128x128xf32>
    %15 = vector.shape_cast %12 : vector<128x128xf32> to vector<1x128x128xf32>
    tpu.vector_store %arg5[%c0_9, %c0_10, %c0_11], %15 {strides = array<i32>} : memref<1x128x128xf32, #tpu.memory_space<vmem>>, vector<1x128x128xf32>,
    return
  }
  func.func @transform_0(%arg0: i32) -> (i32, i32, i32) {
    %c0_i32 = arith.constant 0 : i32
    %c0_i32_0 = arith.constant 0 : i32
    %c0_i32_1 = arith.constant 0 : i32
    return %arg0, %c0_i32, %c0_i32_0 : i32, i32, i32
  }
  func.func @transform_1(%arg0: i32) -> (i32, i32) {
    %c0_i32 = arith.constant 0 : i32
    %c0_i32_0 = arith.constant 0 : i32
    %c0_i32_1 = arith.constant 0 : i32
    return %c0_i32, %c0_i32_0 : i32, i32
  }
  func.func @transform_2(%arg0: i32) -> (i32, i32) {
    %c0_i32 = arith.constant 0 : i32
    %c0_i32_0 = arith.constant 0 : i32
    %c0_i32_1 = arith.constant 0 : i32
    return %c0_i32, %c0_i32_0 : i32, i32
  }
  func.func @transform_3(%arg0: i32) -> (i32, i32, i32) {
    %c0_i32 = arith.constant 0 : i32
    %c0_i32_0 = arith.constant 0 : i32
    %c0_i32_1 = arith.constant 0 : i32
    return %arg0, %c0_i32, %c0_i32_0 : i32, i32, i32
  }
  func.func @transform_4(%arg0: i32) -> (i32, i32, i32) {
    %c0_i32 = arith.constant 0 : i32
    %c0_i32_0 = arith.constant 0 : i32
    %c0_i32_1 = arith.constant 0 : i32
    return %arg0, %c0_i32, %c0_i32_0 : i32, i32, i32
  }
}

</mosaic_0001>

<bundles_post_ra>
// kernel: residual_block_forward.7
= control target key start
LH: loop header
LB: loop body
LE: loop exit
PB: predicated region body
PF: predicated region fallthrough
CT: control target
= control target key end

     0   :  { %s470_s15 = smov 0   ;;  %s591_s0 = inlined_call_operand.vmem [shape: f32[4,128,128], index: 0, kind: input, shape index: {}]   ;;  %s592_s1 = inlined_call_operand.vmem [shape: f32[1,128], index: 1, kind: input, shape index: {}]   ;;  %s593_s2 = inlined_call_operand.vmem [shape: f32[1,128], index: 2, kind: input, shape index: {}]   ;;  %s594_s3 = inlined_call_operand.vmem [shape: f32[4,128,128], index: 3, kind: input, shape index: {}]   ;;  %s595_s4 = inlined_call_operand.vmem [shape: f32[4,128,128], index: 4, kind: output, shape index: {}]  }
   0x1 LB: > { %s411_s16 = sadd.s32 4294967295, %s443_s15   ;;  %p415_p0 = scmp.ge.s32.totalorder %s443_s15, 1  ;;  %s443_s15 = sphi %s470_s15, %s14_s15  }
   0x2   : > { %p172_p1 = scmp.lt.s32.totalorder %s443_s15, 5 }
   0x4   : > { %p173_p2 = pnand %p415_p0, %p172_p1 }
   0x5   : > { %p203_p3 = scmp.lt.s32.totalorder (!%p173_p2), %s411_s16, 3  ;;  %v483_v0 = vld [vmem:[%s592_s1] ss:$0 sm:$0xff] (!%p173_p2) }
   0x6   : > { %176 = sbr.rel (%p173_p2) target bundleno = 39 (0x27), region = 36  ;;  %v501_v2 = vld [vmem:[%s593_s2] ss:$0 sm:$0xff] (!%p173_p2) }
   0xd   : > { %s597_s16 = smov (!%p203_p3, %s411_s16), 3 }
   0xe   : > { %s478_s17 = sshll.u32 %s597_s16, 7 }
   0xf   : > { %s489_s22 = scalar_lea.vmem %s591_s0, %s478_s17  ;;  %s495_s25 = scalar_lea.vmem %s594_s3, %s478_s17 }
  0x10   : > { %v218_v1 = vld [vmem:[%s489_s22] sm:$0xff]  ;;  %v219_v3 = vld [vmem:[%s489_s22 + $0x8] sm:$0xff]  ;;  %v220_v7 = vld [vmem:[%s489_s22 + $0x10] sm:$0xff]  ;;  %s531_s30 = scalar_lea.vmem %s595_s4, %s478_s17 }
  0x11   : > { %v241_v4 = vmul.f32 %v483_v0, %v218_v1  ;;  %v280_v5 = vld [vmem:[%s495_s25] sm:$0xff]  ;;  %v242_v6 = vmul.f32 %v483_v0, %v219_v3  ;;  %v281_v8 = vld [vmem:[%s495_s25 + $0x8] sm:$0xff]  ;;  %v243_v9 = vmul.f32 %v483_v0, %v220_v7  ;;  %v221_v10 = vld [vmem:[%s489_s22 + $0x18] sm:$0xff] }
  0x12   : > { %v222_v11 = vld [vmem:[%s489_s22 + $0x20] sm:$0xff]  ;;  %v282_v14 = vld [vmem:[%s495_s25 + $0x10] sm:$0xff]  ;;  %v244_v15 = vmul.f32 %v483_v0, %v221_v10  ;;  %v283_v16 = vld [vmem:[%s495_s25 + $0x18] sm:$0xff] }
  0x13   : > { %v264_v12 = vadd.f32 %v501_v2, %v241_v4  ;;  %v265_v13 = vadd.f32 %v501_v2, %v242_v6  ;;  %v245_v17 = vmul.f32 %v483_v0, %v222_v11  ;;  %v223_v18 = vld [vmem:[%s489_s22 + $0x28] sm:$0xff]  ;;  %v266_v19 = vadd.f32 %v501_v2, %v243_v9  ;;  %v284_v20 = vld [vmem:[%s495_s25 + $0x20] sm:$0xff]  ;;  %v224_v22 = vld [vmem:[%s489_s22 + $0x30] sm:$0xff] }
  0x14   : > { %v246_v21 = vmul.f32 %v483_v0, %v223_v18  ;;  %v225_v23 = vld [vmem:[%s489_s22 + $0x38] sm:$0xff]  ;;  %v267_v26 = vadd.f32 %v501_v2, %v244_v15  ;;  %v285_v28 = vld [vmem:[%s495_s25 + $0x28] sm:$0xff]  ;;  %v247_v31 = vmul.f32 %v483_v0, %v224_v22  ;;  %v226_v33 = vld [vmem:[%s489_s22 + $0x40] sm:$0xff] }
  0x15   : > { %v296_v24 = vadd.f32 %v280_v5, %v264_v12  ;;  %v297_v25 = vadd.f32 %v281_v8, %v265_v13  ;;  %v268_v27 = vadd.f32 %v501_v2, %v245_v17  ;;  %v298_v29 = vadd.f32 %v282_v14, %v266_v19  ;;  %v227_v34 = vld [vmem:[%s489_s22 + $0x48] sm:$0xff]  ;;  %v286_v39 = vld [vmem:[%s495_s25 + $0x30] sm:$0xff]  ;;  %v287_v40 = vld [vmem:[%s495_s25 + $0x38] sm:$0xff] }
  0x16   : > { %v269_v30 = vadd.f32 %v501_v2, %v246_v21  ;;  %v248_v32 = vmul.f32 %v483_v0, %v225_v23  ;;  %v299_v37 = vadd.f32 %v283_v16, %v267_v26  ;;  %v228_v41 = vld [vmem:[%s489_s22 + $0x50] sm:$0xff]  ;;  %v270_v44 = vadd.f32 %v501_v2, %v247_v31  ;;  %v229_v46 = vld [vmem:[%s489_s22 + $0x58] sm:$0xff]  ;;  %v230_v47 = vld [vmem:[%s489_s22 + $0x60] sm:$0xff] }
  0x17   : > { %v312_v35 = vmax.f32 %v296_v24, 0.0  ;;  %v313_v36 = vmax.f32 %v297_v25, 0.0  ;;  %v300_v38 = vadd.f32 %v284_v20, %v268_v27  ;;  %v314_v42 = vmax.f32 %v298_v29, 0.0  ;;  %v231_v52 = vld [vmem:[%s489_s22 + $0x68] sm:$0xff]  ;;  %v288_v56 = vld [vmem:[%s495_s25 + $0x40] sm:$0xff]  ;;  %v290_v61 = vld [vmem:[%s495_s25 + $0x50] sm:$0xff] }
  0x18   : > { %v301_v43 = vadd.f32 %v285_v28, %v269_v30  ;;  %v271_v45 = vadd.f32 %v501_v2, %v248_v32  ;;  %v315_v48 = vmax.f32 %v299_v37, 0.0  ;;  %v249_v50 = vmul.f32 %v483_v0, %v226_v33  ;;  %v289_v57 = vld [vmem:[%s495_s25 + $0x48] sm:$0xff]  ;;  %v232_v1 = vld [vmem:[%s489_s22 + $0x70] sm:$0xff]  ;;  %v233_v3 = vld [vmem:[%s489_s22 + $0x78] sm:$0xff] }
  0x19   : > { %328 = vst [vmem:[%s531_s30] sm:$0xff] %v312_v35  ;;  %329 = vst [vmem:[%s531_s30 + $0x8] sm:$0xff] %v313_v36  ;;  %v316_v49 = vmax.f32 %v300_v38, 0.0  ;;  %v250_v51 = vmul.f32 %v483_v0, %v227_v34  ;;  %v302_v54 = vadd.f32 %v286_v39, %v270_v44  ;;  %v251_v58 = vmul.f32 %v483_v0, %v228_v41  ;;  %v291_v7 = vld [vmem:[%s495_s25 + $0x58] sm:$0xff]  ;;  %v292_v8 = vld [vmem:[%s495_s25 + $0x60] sm:$0xff] }
  0x1a   : > { %330 = vst [vmem:[%s531_s30 + $0x10] sm:$0xff] %v314_v42  ;;  %v317_v53 = vmax.f32 %v301_v43, 0.0  ;;  %v303_v55 = vadd.f32 %v287_v40, %v271_v45  ;;  %331 = vst [vmem:[%s531_s30 + $0x18] sm:$0xff] %v315_v48  ;;  %v272_v59 = vadd.f32 %v501_v2, %v249_v50  ;;  %v252_v62 = vmul.f32 %v483_v0, %v229_v46  ;;  %v293_v14 = vld [vmem:[%s495_s25 + $0x68] sm:$0xff]  ;;  %v294_v23 = vld [vmem:[%s495_s25 + $0x70] sm:$0xff] }
  0x1b   : > { %332 = vst [vmem:[%s531_s30 + $0x20] sm:$0xff] %v316_v49  ;;  %v273_v60 = vadd.f32 %v501_v2, %v250_v51  ;;  %v253_v63 = vmul.f32 %v483_v0, %v230_v47  ;;  %v318_v4 = vmax.f32 %v302_v54, 0.0  ;;  %v274_v6 = vadd.f32 %v501_v2, %v251_v58  ;;  %v295_v24 = vld [vmem:[%s495_s25 + $0x78] sm:$0xff] }
  0x1c   : > { %333 = vst [vmem:[%s531_s30 + $0x28] sm:$0xff] %v317_v53  ;;  %v319_v5 = vmax.f32 %v303_v55, 0.0  ;;  %v254_v9 = vmul.f32 %v483_v0, %v231_v52  ;;  %v304_v10 = vadd.f32 %v288_v56, %v272_v59  ;;  %v275_v12 = vadd.f32 %v501_v2, %v252_v62 }
  0x1d   : > { %v305_v11 = vadd.f32 %v289_v57, %v273_v60  ;;  %v276_v13 = vadd.f32 %v501_v2, %v253_v63  ;;  %334 = vst [vmem:[%s531_s30 + $0x30] sm:$0xff] %v318_v4  ;;  %v306_v15 = vadd.f32 %v290_v61, %v274_v6  ;;  %v255_v17 = vmul.f32 %v483_v0, %v232_v1 }
  0x1e   : > { %335 = vst [vmem:[%s531_s30 + $0x38] sm:$0xff] %v319_v5  ;;  %v277_v16 = vadd.f32 %v501_v2, %v254_v9  ;;  %v256_v18 = vmul.f32 %v483_v0, %v233_v3  ;;  %v320_v19 = vmax.f32 %v304_v10, 0.0  ;;  %v307_v21 = vadd.f32 %v291_v7, %v275_v12 }
  0x1f   : > { %v321_v20 = vmax.f32 %v305_v11, 0.0  ;;  %v308_v22 = vadd.f32 %v292_v8, %v276_v13  ;;  %v322_v25 = vmax.f32 %v306_v15, 0.0  ;;  %v278_v27 = vadd.f32 %v501_v2, %v255_v17 }
  0x20   : > { %v309_v26 = vadd.f32 %v293_v14, %v277_v16  ;;  %v279_v28 = vadd.f32 %v501_v2, %v256_v18  ;;  %336 = vst [vmem:[%s531_s30 + $0x40] sm:$0xff] %v320_v19  ;;  %v323_v0 = vmax.f32 %v307_v21, 0.0 }
  0x21   : > { %337 = vst [vmem:[%s531_s30 + $0x48] sm:$0xff] %v321_v20  ;;  %v324_v29 = vmax.f32 %v308_v22, 0.0  ;;  %338 = vst [vmem:[%s531_s30 + $0x50] sm:$0xff] %v322_v25  ;;  %v310_v31 = vadd.f32 %v294_v23, %v278_v27 }
  0x22   : > { %v325_v30 = vmax.f32 %v309_v26, 0.0  ;;  %v311_v32 = vadd.f32 %v295_v24, %v279_v28  ;;  %339 = vst [vmem:[%s531_s30 + $0x58] sm:$0xff] %v323_v0 }
  0x23   : > { %340 = vst [vmem:[%s531_s30 + $0x60] sm:$0xff] %v324_v29  ;;  %v326_v33 = vmax.f32 %v310_v31, 0.0 }
  0x24   : > { %341 = vst [vmem:[%s531_s30 + $0x68] sm:$0xff] %v325_v30  ;;  %v327_v34 = vmax.f32 %v311_v32, 0.0 }
  0x25   : > { %342 = vst [vmem:[%s531_s30 + $0x70] sm:$0xff] %v326_v33 }
  0x26   : > { %343 = vst [vmem:[%s531_s30 + $0x78] sm:$0xff] %v327_v34 }
  0x27 PF: > { %s14_s15 = sadd.s32 1, %s443_s15  }
  0x28   : > { %p11_p4 = scmp.ge.s32.totalorder %s14_s15, 6  }
  0x2a   :  { %13 = sbr.rel (!%p11_p4) target bundleno = 1 (0x1), region = 69 }

// kernel: residual_block_forward.5
= control target key start
LH: loop header
LB: loop body
LE: loop exit
PB: predicated region body
PF: predicated region fallthrough
CT: control target
= control target key end

     0   :  { %s371_s12 = smov 0   ;;  %s466_s0 = inlined_call_operand.vmem [shape: f32[4,128,128], index: 0, kind: input, shape index: {}]   ;;  %s467_s1 = inlined_call_operand.vmem [shape: f32[1,128], index: 1, kind: input, shape index: {}]   ;;  %s468_s2 = inlined_call_operand.vmem [shape: f32[1,128], index: 2, kind: input, shape index: {}]   ;;  %s469_s3 = inlined_call_operand.vmem [shape: f32[4,128,128], index: 3, kind: output, shape index: {}]  }
   0x1 LB: > { %s320_s13 = sadd.s32 4294967295, %s349_s12   ;;  %p324_p0 = scmp.ge.s32.totalorder %s349_s12, 1  ;;  %s349_s12 = sphi %s371_s12, %s13_s12  }
   0x2   : > { %p137_p1 = scmp.lt.s32.totalorder %s349_s12, 5 }
   0x4   : > { %p138_p2 = pnand %p324_p0, %p137_p1 }
   0x5   : > { %p161_p3 = scmp.lt.s32.totalorder (!%p138_p2), %s320_s13, 3  ;;  %v382_v0 = vld [vmem:[%s467_s1] ss:$0 sm:$0xff] (!%p138_p2) }
   0x6   : > { %141 = sbr.rel (%p138_p2) target bundleno = 34 (0x22), region = 32  ;;  %v392_v1 = vld [vmem:[%s468_s2] ss:$0 sm:$0xff] (!%p138_p2) }
   0xd   : > { %s471_s13 = smov (!%p161_p3, %s320_s13), 3 }
   0xe   : > { %s333_s14 = sshll.u32 %s471_s13, 7 }
   0xf   : > { %s387_s19 = scalar_lea.vmem %s466_s0, %s333_s14  ;;  %s415_s24 = scalar_lea.vmem %s469_s3, %s333_s14 }
  0x10   : > { %v171_v2 = vld [vmem:[%s387_s19] sm:$0xff]  ;;  %v172_v3 = vld [vmem:[%s387_s19 + $0x8] sm:$0xff]  ;;  %v173_v4 = vld [vmem:[%s387_s19 + $0x10] sm:$0xff] }
  0x11   : > { %v194_v5 = vmul.f32 %v382_v0, %v171_v2  ;;  %v195_v6 = vmul.f32 %v382_v0, %v172_v3  ;;  %v196_v7 = vmul.f32 %v382_v0, %v173_v4  ;;  %v174_v8 = vld [vmem:[%s387_s19 + $0x18] sm:$0xff]  ;;  %v175_v9 = vld [vmem:[%s387_s19 + $0x20] sm:$0xff]  ;;  %v176_v10 = vld [vmem:[%s387_s19 + $0x28] sm:$0xff] }
  0x12   : > { %v197_v11 = vmul.f32 %v382_v0, %v174_v8  ;;  %v198_v12 = vmul.f32 %v382_v0, %v175_v9  ;;  %v199_v13 = vmul.f32 %v382_v0, %v176_v10  ;;  %v177_v14 = vld [vmem:[%s387_s19 + $0x30] sm:$0xff]  ;;  %v178_v15 = vld [vmem:[%s387_s19 + $0x38] sm:$0xff]  ;;  %v179_v24 = vld [vmem:[%s387_s19 + $0x40] sm:$0xff] }
  0x13   : > { %v217_v16 = vadd.f32 %v392_v1, %v194_v5  ;;  %v218_v17 = vadd.f32 %v392_v1, %v195_v6  ;;  %v219_v18 = vadd.f32 %v392_v1, %v196_v7  ;;  %v200_v19 = vmul.f32 %v382_v0, %v177_v14  ;;  %v180_v25 = vld [vmem:[%s387_s19 + $0x48] sm:$0xff]  ;;  %v181_v26 = vld [vmem:[%s387_s19 + $0x50] sm:$0xff]  ;;  %v182_v31 = vld [vmem:[%s387_s19 + $0x58] sm:$0xff] }
  0x14   : > { %v220_v20 = vadd.f32 %v392_v1, %v197_v11  ;;  %v221_v21 = vadd.f32 %v392_v1, %v198_v12  ;;  %v222_v22 = vadd.f32 %v392_v1, %v199_v13  ;;  %v201_v23 = vmul.f32 %v382_v0, %v178_v15  ;;  %v183_v32 = vld [vmem:[%s387_s19 + $0x60] sm:$0xff]  ;;  %v184_v33 = vld [vmem:[%s387_s19 + $0x68] sm:$0xff]  ;;  %v185_v38 = vld [vmem:[%s387_s19 + $0x70] sm:$0xff] }
  0x15   : > { %v233_v27 = vmax.f32 %v217_v16, 0.0  ;;  %v234_v28 = vmax.f32 %v218_v17, 0.0  ;;  %v235_v29 = vmax.f32 %v219_v18, 0.0  ;;  %v223_v30 = vadd.f32 %v392_v1, %v200_v19  ;;  %v186_v43 = vld [vmem:[%s387_s19 + $0x78] sm:$0xff] }
  0x16   : > { %v236_v34 = vmax.f32 %v220_v20, 0.0  ;;  %v237_v35 = vmax.f32 %v221_v21, 0.0  ;;  %v238_v36 = vmax.f32 %v222_v22, 0.0  ;;  %v224_v37 = vadd.f32 %v392_v1, %v201_v23 }
  0x17   : > { %249 = vst [vmem:[%s415_s24] sm:$0xff] %v233_v27  ;;  %250 = vst [vmem:[%s415_s24 + $0x8] sm:$0xff] %v234_v28  ;;  %v239_v39 = vmax.f32 %v223_v30, 0.0  ;;  %v202_v40 = vmul.f32 %v382_v0, %v179_v24  ;;  %v203_v41 = vmul.f32 %v382_v0, %v180_v25  ;;  %v204_v42 = vmul.f32 %v382_v0, %v181_v26 }
  0x18   : > { %251 = vst [vmem:[%s415_s24 + $0x10] sm:$0xff] %v235_v29  ;;  %252 = vst [vmem:[%s415_s24 + $0x18] sm:$0xff] %v236_v34  ;;  %v240_v44 = vmax.f32 %v224_v37, 0.0  ;;  %v205_v45 = vmul.f32 %v382_v0, %v182_v31  ;;  %v206_v46 = vmul.f32 %v382_v0, %v183_v32  ;;  %v207_v47 = vmul.f32 %v382_v0, %v184_v33 }
  0x19   : > { %253 = vst [vmem:[%s415_s24 + $0x20] sm:$0xff] %v237_v35  ;;  %254 = vst [vmem:[%s415_s24 + $0x28] sm:$0xff] %v238_v36  ;;  %v225_v48 = vadd.f32 %v392_v1, %v202_v40  ;;  %v226_v49 = vadd.f32 %v392_v1, %v203_v41  ;;  %v227_v50 = vadd.f32 %v392_v1, %v204_v42 }
  0x1a   : > { %255 = vst [vmem:[%s415_s24 + $0x30] sm:$0xff] %v239_v39  ;;  %v208_v51 = vmul.f32 %v382_v0, %v185_v38  ;;  %256 = vst [vmem:[%s415_s24 + $0x38] sm:$0xff] %v240_v44  ;;  %v228_v52 = vadd.f32 %v392_v1, %v205_v45  ;;  %v229_v53 = vadd.f32 %v392_v1, %v206_v46 }
  0x1b   : > { %v230_v54 = vadd.f32 %v392_v1, %v207_v47  ;;  %v209_v55 = vmul.f32 %v382_v0, %v186_v43  ;;  %v241_v56 = vmax.f32 %v225_v48, 0.0  ;;  %v242_v57 = vmax.f32 %v226_v49, 0.0 }
  0x1c   : > { %v243_v58 = vmax.f32 %v227_v50, 0.0  ;;  %v231_v59 = vadd.f32 %v392_v1, %v208_v51  ;;  %v244_v60 = vmax.f32 %v228_v52, 0.0  ;;  %v245_v61 = vmax.f32 %v229_v53, 0.0 }
  0x1d   : > { %v246_v62 = vmax.f32 %v230_v54, 0.0  ;;  %v232_v63 = vadd.f32 %v392_v1, %v209_v55  ;;  %257 = vst [vmem:[%s415_s24 + $0x40] sm:$0xff] %v241_v56  ;;  %258 = vst [vmem:[%s415_s24 + $0x48] sm:$0xff] %v242_v57 }
  0x1e   : > { %259 = vst [vmem:[%s415_s24 + $0x50] sm:$0xff] %v243_v58  ;;  %v247_v2 = vmax.f32 %v231_v59, 0.0  ;;  %260 = vst [vmem:[%s415_s24 + $0x58] sm:$0xff] %v244_v60 }
  0x1f   : > { %261 = vst [vmem:[%s415_s24 + $0x60] sm:$0xff] %v245_v61  ;;  %262 = vst [vmem:[%s415_s24 + $0x68] sm:$0xff] %v246_v62  ;;  %v248_v0 = vmax.f32 %v232_v63, 0.0 }
  0x20   : > { %263 = vst [vmem:[%s415_s24 + $0x70] sm:$0xff] %v247_v2 }
  0x21   : > { %264 = vst [vmem:[%s415_s24 + $0x78] sm:$0xff] %v248_v0 }
  0x22 PF: > { %s13_s12 = sadd.s32 1, %s349_s12  }
  0x23   : > { %p10_p4 = scmp.ge.s32.totalorder %s13_s12, 6  }
  0x25   :  { %12 = sbr.rel (!%p10_p4) target bundleno = 1 (0x1), region = 62 }

// kernel: residual_block_forward.4
= control target key start
LH: loop header
LB: loop body
LE: loop exit
PB: predicated region body
PF: predicated region fallthrough
CT: control target
= control target key end

     0   :  { %s4014_s21 = smov 0   ;;  %s4016_s22 = smov 0   ;;  %s5011_s0 = inlined_call_operand.vmem [shape: f32[2,24,24,128], index: 0, kind: input, shape index: {}, may-alias: {0,1,2}]   ;;  %s5012_s1 = inlined_call_operand.vmem [shape: f32[2,24,24,128], index: 1, kind: input, shape index: {}, may-alias: {0,1,2}]   ;;  %s5013_s2 = inlined_call_operand.vmem [shape: f32[2,24,24,128], index: 2, kind: input, shape index: {}, may-alias: {0,1,2}]   ;;  %s5014_s3 = inlined_call_operand.vmem [shape: f32[9,128,128], index: 3, kind: input, shape index: {}]   ;;  %s5015_s4 = inlined_call_operand.vmem [shape: f32[4,128,128], index: 4, kind: output, shape index: {0}]   ;;  %s5016_s5 = inlined_call_operand.vmem [shape: f32[2,2,8,128], index: 5, kind: output, shape index: {1}]   ;;  %s5017_s6 = inlined_call_operand.vmem [shape: f32[2,2,8,128], index: 6, kind: output, shape index: {2}]  }
   0x1   :  { %s4018_s23 = smov 0   ;;  %s4020_s24 = smov 0  }
   0x2   :  { %s4022_s25 = smov 0  }
   0x3 LB: > { %s26_s26 = sadd.s32 1, %s3969_s23  ;;  %s29_s27 = sadd.s32 1, %s3973_s24  ;;  %s3977_s25 = sphi %s4022_s25, %s17_s25   ;;  %s3973_s24 = sphi %s4020_s24, %s5026_s24   ;;  %s3969_s23 = sphi %s4018_s23, %s5025_s23   ;;  %s3965_s22 = sphi %s4016_s22, %s5024_s22   ;;  %s3961_s21 = sphi %s4014_s21, %s5023_s21  }
   0x4   : > { %p27_p0 = scmp.ge.s32.totalorder %s26_s26, 2  ;;  %p2512_p1 = scmp.ge.s32.totalorder %s3977_s25, 1 }
   0x5   : > { %p297_p2 = scmp.lt.s32.totalorder %s3977_s25, 5 }
   0x6   : > { %s5028_s26 = smov (%p27_p0, %s26_s26), 0  ;;  %s5030_s27 = smov (!%p27_p0, %s29_s27), %s3973_s24 }
   0x7   : > { %p298_p3 = pnand %p2512_p1, %p297_p2  ;;  %p31_p4 = scmp.ge.s32.totalorder %s5030_s27, 2 }
   0x9   : > { %s5032_s27 = smov (%p31_p4, %s5030_s27), 0  ;;  %301 = sbr.rel (%p298_p3) target bundleno = 442 (0x1ba), region = 36 }
  0x10   : > { %v2526_v0 = vld [vmem:[%s5014_s3 + $0x80] sm:$0xff]  ;;  %v2527_v1 = vld [vmem:[%s5014_s3 + $0x88] sm:$0xff]  ;;  %s4058_s10 = sshll.u32 %s3961_s21, 3  ;;  %p374_p5 = scmp.lt.s32.totalorder %s3965_s22, 1  ;;  %v2528_v5 = vld [vmem:[%s5014_s3 + $0x90] sm:$0xff]  ;;  %vm507_vm0 = vcmask 1046528  }
  0x11   : > { %v2574_v2 = vld [vmem:[%s5014_s3 + $0x200] sm:$0xff]  ;;  %v3461_v3 = vpack.c.bf16 %v2527_v1, %v2526_v0  ;;  %v2575_v4 = vld [vmem:[%s5014_s3 + $0x208] sm:$0xff]  ;;  %v2529_v6 = vld [vmem:[%s5014_s3 + $0x98] sm:$0xff]  ;;  %p376_p6 = scmp.lt.s32.totalorder %s4058_s10, 23  ;;  %s4103_s28 = sadd.s32 8, %s4058_s10  ;;  %vm871_vm1 = vcmask 1045504  }
  0x12   : > { %v3589_v7 = vpack.c.bf16 %v2575_v4, %v2574_v2  ;;  %v3465_v8 = vpack.c.bf16 %v2529_v6, %v2528_v5  ;;  %v2576_v9 = vld [vmem:[%s5014_s3 + $0x210] sm:$0xff]  ;;  %v2577_v10 = vld [vmem:[%s5014_s3 + $0x218] sm:$0xff]  ;;  %v2530_v11 = vld [vmem:[%s5014_s3 + $0xa0] sm:$0xff]  ;;  %s4081_s30 = scalar_select %p374_p5, %s3965_s22, 1 }
  0x13   : > { %3462 = vmatprep.subr.bf16.mxu1 %v3461_v3  ;;  %v3593_v12 = vpack.c.bf16 %v2577_v10, %v2576_v9  ;;  %v2531_v13 = vld [vmem:[%s5014_s3 + $0xa8] sm:$0xff]  ;;  %v2578_v14 = vld [vmem:[%s5014_s3 + $0x220] sm:$0xff]  ;;  %s377_s14 = scalar_select %p376_p6, %s4058_s10, 23  ;;  %v2532_v18 = vld [vmem:[%s5014_s3 + $0xb0] sm:$0xff] }
  0x14   : > { %v2579_v15 = vld [vmem:[%s5014_s3 + $0x228] sm:$0xff]  ;;  %3590 = vmatprep.subr.bf16.mxu0 %v3589_v7  ;;  %3464 = vmatpush3.bf16.msra.mxu1 %v3461_v3  ;;  %s4094_s15 = smul.u32 72, %s4081_s30  ;;  %v3469_v16 = vpack.c.bf16 %v2531_v13, %v2530_v11  ;;  %v2533_v19 = vld [vmem:[%s5014_s3 + $0xb8] sm:$0xff]  ;;  %v2580_v20 = vld [vmem:[%s5014_s3 + $0x230] sm:$0xff]  ;;  %s399_s12 = sadd.s32 1, %s4103_s28 }
  0x15   : > { %3592 = vmatpush3.bf16.msra.mxu0 %v3589_v7  ;;  %3466 = vmatprep.subr.bf16.mxu1 %v3465_v8  ;;  %s3893_s16 = smul.u32 3, %s377_s14  ;;  %v3597_v17 = vpack.c.bf16 %v2579_v15, %v2578_v14  ;;  %v2581_v21 = vld [vmem:[%s5014_s3 + $0x238] sm:$0xff]  ;;  %v3473_v22 = vpack.c.bf16 %v2533_v19, %v2532_v18  ;;  %v2534_v23 = vld [vmem:[%s5014_s3 + $0xc0] sm:$0xff]  ;;  %v2535_v24 = vld [vmem:[%s5014_s3 + $0xc8] sm:$0xff]  ;;  %p4135_p7 = scmp.lt.s32.totalorder %s399_s12, 23 }
  0x16   : > { %3594 = vmatprep.subr.bf16.mxu0 %v3593_v12  ;;  %v3601_v25 = vpack.c.bf16 %v2581_v21, %v2580_v20  ;;  %v2582_v26 = vld [vmem:[%s5014_s3 + $0x240] sm:$0xff]  ;;  %v2583_v27 = vld [vmem:[%s5014_s3 + $0x248] sm:$0xff]  ;;  %v3477_v36 = vpack.c.bf16 %v2535_v24, %v2534_v23  ;;  %v2536_v38 = vld [vmem:[%s5014_s3 + $0xd0] sm:$0xff]  ;;  %p388_p8 = scmp.lt.s32.totalorder %s4103_s28, 23  ;;  %p423_p10 = scmp.lt.s32.totalorder %s3961_s21, 1 }
  0x17   : > { %s380_s11 = sadd.s32 %s4094_s15, %s3893_s16  ;;  %v3605_v37 = vpack.c.bf16 %v2583_v27, %v2582_v26  ;;  %v2537_v39 = vld [vmem:[%s5014_s3 + $0xd8] sm:$0xff]  ;;  %s5034_s12 = smov (!%p4135_p7, %s399_s12), 23  ;;  %v2584_v42 = vld [vmem:[%s5014_s3 + $0x250] sm:$0xff]  ;;  %v2538_v46 = vld [vmem:[%s5014_s3 + $0xe0] sm:$0xff] }
  0x18   : > { %3468 = vmatpush3.bf16.msra.mxu1 %v3465_v8  ;;  %s2514_s13 = sshll.u32 %s380_s11, 3  ;;  %v2585_v43 = vld [vmem:[%s5014_s3 + $0x258] sm:$0xff]  ;;  %s3896_s7 = smul.u32 3, %s5034_s12  ;;  %v3481_v44 = vpack.c.bf16 %v2537_v39, %v2536_v38  ;;  %v2539_v47 = vld [vmem:[%s5014_s3 + $0xe8] sm:$0xff]  ;;  %v2586_v48 = vld [vmem:[%s5014_s3 + $0x260] sm:$0xff] }
  0x19   : > { %3596 = vmatpush3.bf16.msra.mxu0 %v3593_v12  ;;  %3470 = vmatprep.subr.bf16.mxu1 %v3469_v16  ;;  %s4122_s29 = scalar_lea.vmem %s5011_s0, %s2514_s13  ;;  %v3609_v45 = vpack.c.bf16 %v2585_v43, %v2584_v42  ;;  %v2587_v49 = vld [vmem:[%s5014_s3 + $0x268] sm:$0xff]  ;;  %v3485_v50 = vpack.c.bf16 %v2539_v47, %v2538_v46  ;;  %v2540_v52 = vld [vmem:[%s5014_s3 + $0xf0] sm:$0xff]  ;;  %v2541_v53 = vld [vmem:[%s5014_s3 + $0xf8] sm:$0xff]  ;;  %s5036_s28 = smov (!%p388_p8, %s4103_s28), 23 }
  0x1a   : > { %3598 = vmatprep.subr.bf16.mxu0 %v3597_v17  ;;  %v4131_v28 = vld [vmem:[%s4122_s29] sm:$0xff]  ;;  %v4140_v29 = vld [vmem:[%s4122_s29 + $0x8] sm:$0xff]  ;;  %v4144_v31 = vld [vmem:[%s4122_s29 + $0x18] sm:$0xff]  ;;  %s4184_s14 = sadd.s32 %s3896_s7, %s4094_s15  ;;  %v3613_v51 = vpack.c.bf16 %v2587_v49, %v2586_v48  ;;  %v3489_v56 = vpack.c.bf16 %v2541_v53, %v2540_v52  ;;  %s3895_s16 = smul.u32 3, %s5036_s28 }
  0x1b   : > { %v508_v30 = vrot.slane %v4131_v28, 1  ;;  %v4147_v32 = vld [vmem:[%s4122_s29 + $0x20] sm:$0xff]  ;;  %v509_v33 = vrot.slane %v4140_v29, 1  ;;  %v513_v34 = vrot.slane %v4144_v31, 1  ;;  %v2588_v54 = vld [vmem:[%s5014_s3 + $0x270] sm:$0xff]  ;;  %v2589_v55 = vld [vmem:[%s5014_s3 + $0x278] sm:$0xff] }
  0x1c   : > { %3472 = vmatpush3.bf16.msra.mxu1 %v3469_v16  ;;  %v514_v35 = vrot.slane %v4147_v32, 1  ;;  %v4205_v57 = vld [vmem:[%s4122_s29 + $0x10] sm:$0xff]  ;;  %v3617_v58 = vpack.c.bf16 %v2589_v55, %v2588_v54  ;;  %v467_v59 = vld [vmem:[%s5014_s3] sm:$0xff]  ;;  %v468_v60 = vld [vmem:[%s5014_s3 + $0x8] sm:$0xff]  ;;  %v872_v39 = vrot.slane %v4131_v28, 2  ;;  %s4363_s10 = sadd.s32 %s3895_s16, %s4094_s15  ;;  %s2518_s20 = sshll.u32 %s4184_s14, 3 }
  0x1d   : > { %3600 = vmatpush3.bf16.msra.mxu0 %v3597_v17  ;;  %3474 = vmatprep.subr.bf16.mxu1 %v3473_v22  ;;  %v510_v40 = vsel %vm507_vm0, %v508_v30, %v509_v33  ;;  %v4214_v61 = vld [vmem:[%s4122_s29 + $0x28] sm:$0xff]  ;;  %v2590_v62 = vld [vmem:[%s5014_s3 + $0x280] sm:$0xff]  ;;  %v511_v0 = vrot.slane %v4205_v57, 1  ;;  %v4224_v1 = vld [vmem:[%s4122_s29 + $0x30] sm:$0xff]  ;;  %v3493_v3 = vpack.c.bf16 %v468_v60, %v467_v59  ;;  %s2516_s16 = sshll.u32 %s4363_s10, 3  ;;  %s408_s11 = scalar_lea.vmem %s5013_s2, %s2518_s20 }
  0x1e   : > { %3602 = vmatprep.subr.bf16.mxu0 %v3601_v25  ;;  %v4164_v41 = vsel %vm507_vm0, %v513_v34, %v514_v35  ;;  %2989 = vmatprep.mubr.f32.mxu1 %v510_v40  ;;  %v2591_v63 = vld [vmem:[%s5014_s3 + $0x288] sm:$0xff]  ;;  %v4227_v2 = vld [vmem:[%s4122_s29 + $0x38] sm:$0xff]  ;;  %v516_v4 = vrot.slane %v4214_v61, 1  ;;  %v4231_v6 = vld [vmem:[%s4122_s29 + $0x40] sm:$0xff]  ;;  %v518_v7 = vrot.slane %v4224_v1, 1  ;;  %s4425_s8 = scalar_lea.vmem %s5012_s1, %s2516_s16  ;;  %s2519_s10 = sshll.u32 %s3965_s22, 1 }
  0x1f   : > { %3213 = vmatprep.mubr.f32.mxu0 %v4164_v41  ;;  %v3621_v5 = vpack.c.bf16 %v2591_v63, %v2590_v62  ;;  %v519_v8 = vrot.slane %v4227_v2, 1  ;;  %v469_v9 = vld [vmem:[%s5014_s3 + $0x10] sm:$0xff]  ;;  %v470_v10 = vld [vmem:[%s5014_s3 + $0x18] sm:$0xff]  ;;  %v512_v12 = vsel %vm507_vm0, %v509_v33, %v511_v0  ;;  %v4252_v14 = vld [vmem:[%s4122_s29 + $0x48] sm:$0xff]  ;;  %v521_v17 = vrot.slane %v4231_v6, 1  ;;  %s413_s17 = sadd.s32 %s3961_s21, %s2519_s10  ;;  %s5040_s21 = smov (!%p423_p10, %s3961_s21), 1 }
  0x20   : > { %3476 = vmatpush3.bf16.msra.mxu1 %v3473_v22  ;;  %v2592_v11 = vld [vmem:[%s5014_s3 + $0x290] sm:$0xff]  ;;  %v2593_v13 = vld [vmem:[%s5014_s3 + $0x298] sm:$0xff]  ;;  %v517_v16 = vsel %vm507_vm0, %v514_v35, %v516_v4  ;;  %v3497_v18 = vpack.c.bf16 %v470_v10, %v469_v9  ;;  %v523_v22 = vrot.slane %v4252_v14, 1  ;;  %v471_v24 = vld [vmem:[%s5014_s3 + $0x20] sm:$0xff]  ;;  %p414_p9 = scmp.lt.s32.totalorder %s413_s17, 3  ;;  %s2522_s20 = sshll.u32 %s4081_s30, 1 }
  0x21   : > { %3604 = vmatpush3.bf16.msra.mxu0 %v3601_v25  ;;  %3478 = vmatprep.subr.bf16.mxu1 %v3477_v36  ;;  %v4255_v15 = vld [vmem:[%s4122_s29 + $0x50] sm:$0xff]  ;;  %v4262_v19 = vld [vmem:[%s4122_s29 + $0x58] sm:$0xff]  ;;  %v4265_v20 = vsel %vm507_vm0, %v518_v7, %v519_v8  ;;  %v3625_v21 = vpack.c.bf16 %v2593_v13, %v2592_v11  ;;  %v472_v25 = vld [vmem:[%s5014_s3 + $0x28] sm:$0xff]  ;;  %v4294_v34 = vsel %vm507_vm0, %v519_v8, %v521_v17  ;;  %s426_s15 = sadd.s32 %s2522_s20, %s5040_s21 }
  0x22   : > { %3606 = vmatprep.subr.bf16.mxu0 %v3605_v37  ;;  %v524_v23 = vrot.slane %v4255_v15, 1  ;;  %v2594_v26 = vld [vmem:[%s5014_s3 + $0x2a0] sm:$0xff]  ;;  %v2595_v27 = vld [vmem:[%s5014_s3 + $0x2a8] sm:$0xff]  ;;  %v526_v35 = vrot.slane %v4262_v19, 1  ;;  %v4300_v38 = vld [vmem:[%s4122_s29 + $0x70] sm:$0xff]  ;;  %s5038_s17 = smov (!%p414_p9, %s413_s17), 3 }
  0x23   : > { %v4287_v30 = vld [vmem:[%s4122_s29 + $0x60] sm:$0xff]  ;;  %v4290_v33 = vld [vmem:[%s4122_s29 + $0x68] sm:$0xff]  ;;  %v2596_v46 = vld [vmem:[%s5014_s3 + $0x2b0] sm:$0xff]  ;;  %v531_v52 = vrot.slane %v4300_v38, 1  ;;  %s2668_s22 = sshll.u32 %s5038_s17, 7  ;;  %s2523_s14 = sshll.u32 %s426_s15, 3 }
  0x24   : > { %3480 = vmatpush3.bf16.msra.mxu1 %v3477_v36  ;;  %v875_v36 = vrot.slane %v4205_v57, 2  ;;  %v4304_v40 = vsel %vm507_vm0, %v523_v22, %v524_v23  ;;  %v528_v42 = vrot.slane %v4287_v30, 1  ;;  %v529_v43 = vrot.slane %v4290_v33, 1  ;;  %v2597_v47 = vld [vmem:[%s5014_s3 + $0x2b8] sm:$0xff]  ;;  %v4326_v49 = vld [vmem:[%s4122_s29 + $0x80] sm:$0xff]  ;;  %v4339_v55 = vld [vmem:[%s4122_s29 + $0x88] sm:$0xff]  ;;  %s4953_s19 = scalar_lea.vmem %s5015_s4, %s2668_s22  ;;  %s428_s16 = scalar_lea.vmem %s5016_s5, %s2523_s14 }
  0x25   : > { %3608 = vmatpush3.bf16.msra.mxu0 %v3605_v37  ;;  %3482 = vmatprep.subr.bf16.mxu1 %v3481_v44  ;;  %v3501_v37 = vpack.c.bf16 %v472_v25, %v471_v24  ;;  %v4323_v48 = vld [vmem:[%s4122_s29 + $0x78] sm:$0xff]  ;;  %v475_v54 = vld [vmem:[%s5014_s3 + $0x40] sm:$0xff]  ;;  %v3633_v59 = vpack.c.bf16 %v2597_v47, %v2596_v46  ;;  %v534_v62 = vrot.slane %v4326_v49, 1  ;;  %v476_v63 = vld [vmem:[%s5014_s3 + $0x48] sm:$0xff]  ;;  %v536_v8 = vrot.slane %v4339_v55, 1 }
  0x26   : > { %3610 = vmatprep.subr.bf16.mxu0 %v3609_v45  ;;  %v533_v60 = vrot.slane %v4323_v48, 1  ;;  %v4357_v0 = vld [vmem:[%s4122_s29 + $0x90] sm:$0xff]  ;;  %v2598_v4 = vld [vmem:[%s5014_s3 + $0x2c0] sm:$0xff]  ;;  %v4375_v7 = vsel %vm507_vm0, %v529_v43, %v531_v52  ;;  %v3509_v9 = vpack.c.bf16 %v476_v63, %v475_v54  ;;  %v2601_v24 = vld [vmem:[%s5014_s3 + $0x2d8] sm:$0xff] }
  0x27   : > { %v538_v10 = vrot.slane %v4357_v0, 1  ;;  %v4385_v13 = vld [vmem:[%s4122_s29 + $0xa0] sm:$0xff]  ;;  %v4399_v22 = vld [vmem:[%s4122_s29 + $0xb0] sm:$0xff]  ;;  %v4413_v25 = vsel %vm507_vm0, %v534_v62, %v536_v8  ;;  %v2603_v47 = vld [vmem:[%s5014_s3 + $0x2e8] sm:$0xff] }
  0x28   : > { %3484 = vmatpush3.bf16.msra.mxu1 %v3481_v44  ;;  %v473_v44 = vld [vmem:[%s5014_s3 + $0x30] sm:$0xff]  ;;  %v2602_v46 = vld [vmem:[%s5014_s3 + $0x2e0] sm:$0xff] }
  0x29   : > { %3612 = vmatpush3.bf16.msra.mxu0 %v3609_v45  ;;  %3486 = vmatprep.subr.bf16.mxu1 %v3485_v50  ;;  %v474_v45 = vld [vmem:[%s5014_s3 + $0x38] sm:$0xff] }
  0x2a   : > { %3614 = vmatprep.subr.bf16.mxu0 %v3613_v51  ;;  %v3505_v53 = vpack.c.bf16 %v474_v45, %v473_v44  ;;  %v466_v44 = vld [vmem:[%s408_s11 + $0x10] sm:$0xff] }
  0x2b   : > { %v1841_v54 = vrot.slane %v466_v44, 1 }
  0x2c   : > { %3488 = vmatpush3.bf16.msra.mxu1 %v3485_v50  ;;  %v873_v50 = vrot.slane %v4140_v29, 2 }
  0x2d   : > { %3616 = vmatpush3.bf16.msra.mxu0 %v3613_v51  ;;  %3490 = vmatprep.subr.bf16.mxu1 %v3489_v56  ;;  %v4331_v51 = vsel %vm507_vm0, %v524_v23, %v526_v35  ;;  %v2600_v23 = vld [vmem:[%s5014_s3 + $0x2d0] sm:$0xff]  ;;  %v480_v35 = vld [vmem:[%s5014_s3 + $0x68] sm:$0xff] }
  0x2e   : > { %3618 = vmatprep.subr.bf16.mxu0 %v3617_v58  ;;  %v4345_v57 = vsel %vm871_vm1, %v873_v50, %v875_v36  ;;  %v3641_v45 = vpack.c.bf16 %v2601_v24, %v2600_v23  ;;  %v481_v24 = vld [vmem:[%s5014_s3 + $0x70] sm:$0xff] }
  0x30   : > { %3492 = vmatpush3.bf16.msra.mxu1 %v3489_v56  ;;  %v4342_v56 = vsel %vm871_vm1, %v872_v39, %v873_v50 }
  0x31   : > { %3620 = vmatpush3.bf16.msra.mxu0 %v3617_v58  ;;  %3494 = vmatprep.subr.bf16.mxu1 %v3493_v3  ;;  %v4349_v58 = vsel %vm507_vm0, %v528_v42, %v529_v43  ;;  %v4434_v42 = vld [vmem:[%s4122_s29 + $0xb8] sm:$0xff]  ;;  %v4436_v43 = vld [vmem:[%s408_s11] sm:$0xff] }
  0x32   : > { %3622 = vmatprep.subr.bf16.mxu0 %v3621_v5  ;;  %v1838_v50 = vrot.slane %v4436_v43, 1  ;;  %v2023_v52 = vrot.slane %v4436_v43, 2 }
  0x33   : > { %2990 = vmatmul.mubr.f32.vlgmr.msra.gmra.mrb[0].mxu1 %v512_v12  ;;  %v477_v12 = vld [vmem:[%s5014_s3 + $0x50] sm:$0xff] }
  0x34   : > { %3214 = vmatmul.mubr.f32.vlgmr.msra.gmra.mrb[0].mxu0 %v517_v16  ;;  %3496 = vmatpush3.bf16.msra.mxu1 %v3493_v3  ;;  %v4360_v3 = vld [vmem:[%s4122_s29 + $0x98] sm:$0xff] }
  0x35   : > { %3624 = vmatpush3.bf16.msra.mxu0 %v3621_v5  ;;  %2992 = vmatprep.mubr.f32.mxu1 %v4164_v41  ;;  %v3629_v41 = vpack.c.bf16 %v2595_v27, %v2594_v26  ;;  %v2599_v5 = vld [vmem:[%s5014_s3 + $0x2c8] sm:$0xff]  ;;  %v539_v11 = vrot.slane %v4360_v3, 1  ;;  %v541_v26 = vrot.slane %v4385_v13, 1  ;;  %v479_v27 = vld [vmem:[%s5014_s3 + $0x60] sm:$0xff] }
  0x36   : > { %3216 = vmatprep.mubr.f32.mxu0 %v4265_v20  ;;  %3498 = vmatprep.subr.bf16.mxu1 %v3497_v18  ;;  %v3637_v17 = vpack.c.bf16 %v2599_v5, %v2598_v4  ;;  %v2026_v4 = vrot.slane %v466_v44, 2  ;;  %v3517_v8 = vpack.c.bf16 %v480_v35, %v479_v27  ;;  %v2605_v44 = vld [vmem:[%s5014_s3 + $0x2f8] sm:$0xff] }
  0x37   : > { %2993 = vmatmul.mubr.f32.gmra.mrb[2].mxu1 %v517_v16  ;;  %3626 = vmatprep.subr.bf16.mxu0 %v3625_v21  ;;  %v4390_v16 = vsel %vm507_vm0, %v533_v60, %v534_v62  ;;  %v4429_v36 = vsel %vm507_vm0, %v538_v10, %v539_v11  ;;  %v4454_v60 = vld [vmem:[%s4425_s8 + $0x8] sm:$0xff]  ;;  %v4460_v5 = vsel %vm507_vm0, %v539_v11, %v541_v26  ;;  %v546_v10 = vrot.slane %v4434_v42, 1  ;;  %v482_v26 = vld [vmem:[%s5014_s3 + $0x78] sm:$0xff] }
  0x38   : > { %3217 = vmatmul.mubr.f32.gmra.mrb[2].mxu0 %v4294_v34  ;;  %3500 = vmatpush3.bf16.msra.mxu1 %v3497_v18  ;;  %v478_v18 = vld [vmem:[%s5014_s3 + $0x58] sm:$0xff] }
  0x39   : > { %3628 = vmatpush3.bf16.msra.mxu0 %v3625_v21  ;;  %2995 = vmatprep.mubr.f32.mxu1 %v4265_v20  ;;  %v4396_v21 = vld [vmem:[%s4122_s29 + $0xa8] sm:$0xff] }
  0x3a   : > { %3219 = vmatprep.mubr.f32.mxu0 %v4304_v40  ;;  %3502 = vmatprep.subr.bf16.mxu1 %v3501_v37  ;;  %v543_v39 = vrot.slane %v4396_v21, 1 }
  0x3b   : > { %2996 = vmatmul.mubr.f32.gmra.mrb[4].mxu1 %v4294_v34  ;;  %3630 = vmatprep.subr.bf16.mxu0 %v3629_v41 }
  0x3c   : > { %3220 = vmatmul.mubr.f32.gmra.mrb[4].mxu0 %v4331_v51  ;;  %3504 = vmatpush3.bf16.msra.mxu1 %v3501_v37  ;;  %v3513_v37 = vpack.c.bf16 %v478_v18, %v477_v12  ;;  %v3645_v12 = vpack.c.bf16 %v2603_v47, %v2602_v46  ;;  %v4468_v18 = vld [vmem:[%s4425_s8 + $0x10] sm:$0xff] }
  0x3d   : > { %3632 = vmatpush3.bf16.msra.mxu0 %v3629_v41  ;;  %2998 = vmatprep.mubr.f32.mxu1 %v4304_v40  ;;  %v544_v41 = vrot.slane %v4399_v22, 1 }
  0x3e   : > { %3222 = vmatprep.mubr.f32.mxu0 %v4349_v58  ;;  %3506 = vmatprep.subr.bf16.mxu1 %v3505_v53 }
  0x3f   : > { %2999 = vmatmul.mubr.f32.gmra.mrb[6].mxu1 %v4331_v51  ;;  %3634 = vmatprep.subr.bf16.mxu0 %v3633_v59  ;;  %v4500_v47 = vsel %vm507_vm0, %v544_v41, %v546_v10  ;;  %v2607_v10 = vld [vmem:[%s5014_s3 + $0x308] sm:$0xff] }
  0x40   : > { %3223 = vmatmul.mubr.f32.gmra.mrb[6].mxu0 %v4375_v7  ;;  %3508 = vmatpush3.bf16.msra.mxu1 %v3505_v53  ;;  %v4447_v53 = vld [vmem:[%s408_s11 + $0x8] sm:$0xff] }
  0x41   : > { %3636 = vmatpush3.bf16.msra.mxu0 %v3633_v59  ;;  %3001 = vmatprep.mubr.f32.mxu1 %v4349_v58  ;;  %v4451_v59 = vld [vmem:[%s4425_s8] sm:$0xff]  ;;  %v1839_v62 = vrot.slane %v4447_v53, 1  ;;  %v2024_v63 = vrot.slane %v4447_v53, 2 }
  0x42   : > { %3225 = vmatprep.mubr.f32.mxu0 %v4390_v16  ;;  %3510 = vmatprep.subr.bf16.mxu1 %v3509_v9  ;;  %v1287_v11 = vrot.slane %v4451_v59, 1 }
  0x43   : > { %3002 = vmatmul.mubr.f32.gmra.mrb[8].mxu1 %v4375_v7  ;;  %3638 = vmatprep.subr.bf16.mxu0 %v3637_v17  ;;  %v4471_v23 = vsel %vm507_vm0, %v1838_v50, %v1839_v62  ;;  %v4483_v27 = vsel %vm507_vm0, %v1839_v62, %v1841_v54  ;;  %v4486_v35 = vsel %vm871_vm1, %v2023_v52, %v2024_v63  ;;  %v1290_v50 = vrot.slane %v4468_v18, 1 }
  0x44   : > { %3226 = vmatmul.mubr.f32.gmra.mrb[8].mxu0 %v4413_v25  ;;  %3512 = vmatpush3.bf16.msra.mxu1 %v3509_v9  ;;  %v4465_v9 = vsel %vm507_vm0, %v543_v39, %v544_v41  ;;  %5019 = vst [vmem:[#allocation2_spill] sm:$0xff] %v4486_v35  ;;  %v2604_v39 = vld [vmem:[%s5014_s3 + $0x2f0] sm:$0xff]  ;;  %v4496_v46 = vsel %vm871_vm1, %v2024_v63, %v2026_v4  ;;  %v878_v62 = vrot.slane %v4147_v32, 2  ;;  %v2542_v41 = vld [vmem:[%s5014_s3 + $0x100] sm:$0xff]  ;;  %v2543_v63 = vld [vmem:[%s5014_s3 + $0x108] sm:$0xff]  ;;  %v1473_v35 = vrot.slane %v4454_v60, 2 }
  0x45   : > { %3640 = vmatpush3.bf16.msra.mxu0 %v3637_v17  ;;  %3004 = vmatprep.mubr.f32.mxu1 %v4390_v16  ;;  %v1288_v17 = vrot.slane %v4454_v60, 1  ;;  %5020 = vst [vmem:[#allocation3_spill] sm:$0xff] %v4496_v46  ;;  %v3649_v54 = vpack.c.bf16 %v2605_v44, %v2604_v39  ;;  %v2606_v4 = vld [vmem:[%s5014_s3 + $0x300] sm:$0xff]  ;;  %v882_v44 = vrot.slane %v4224_v1, 2  ;;  %v908_v46 = vrot.slane %v4399_v22, 2 }
  0x46   : > { %3228 = vmatprep.mubr.f32.mxu0 %v4429_v36  ;;  %3514 = vmatprep.subr.bf16.mxu1 %v3513_v37  ;;  %v3653_v39 = vpack.c.bf16 %v2607_v10, %v2606_v4 }
  0x47   : > { %3005 = vmatmul.mubr.f32.gmra.mrb[10].mxu1 %v4413_v25  ;;  %3642 = vmatprep.subr.bf16.mxu0 %v3641_v45  ;;  %v4506_v52 = vsel %vm507_vm0, %v1287_v11, %v1288_v17  ;;  %v880_v11 = vrot.slane %v4214_v61, 2  ;;  %v883_v61 = vrot.slane %v4227_v2, 2 }
  0x48   : > { %3229 = vmatmul.mubr.f32.gmra.mrb[10].mxu0 %v4460_v5  ;;  %3516 = vmatpush3.bf16.msra.mxu1 %v3513_v37  ;;  %v3521_v37 = vpack.c.bf16 %v482_v26, %v481_v24  ;;  %v4526_v24 = vsel %vm507_vm0, %v1288_v17, %v1290_v50  ;;  %v2545_v17 = vld [vmem:[%s5014_s3 + $0x118] sm:$0xff]  ;;  %v2608_v50 = vld [vmem:[%s5014_s3 + $0x310] sm:$0xff] }
  0x49   : > { %3644 = vmatpush3.bf16.msra.mxu0 %v3641_v45  ;;  %3007 = vmatprep.mubr.f32.mxu1 %v4429_v36  ;;  %v877_v45 = vrot.slane %v4144_v31, 2  ;;  %v4556_v4 = vsel %vm871_vm1, %v882_v44, %v883_v61 }
  0x4a   : > { %3231 = vmatprep.mubr.f32.mxu0 %v4465_v9  ;;  %3518 = vmatprep.subr.bf16.mxu1 %v3517_v8 }
  0x4b   : > { %3008 = vmatmul.mubr.f32.gmra.mrb[12].mxu1 %v4460_v5  ;;  %3646 = vmatprep.subr.bf16.mxu0 %v3645_v12  ;;  %v4531_v26 = vsel %vm871_vm1, %v877_v45, %v878_v62  ;;  %v2609_v45 = vld [vmem:[%s5014_s3 + $0x318] sm:$0xff] }
  0x4c   : > { %3232 = vmatmul.mubr.f32.gmra.mrb[12].mxu0 %v4500_v47  ;;  %3520 = vmatpush3.bf16.msra.mxu1 %v3517_v8  ;;  %v3525_v8 = vpack.c.bf16 %v2543_v63, %v2542_v41  ;;  %v4550_v41 = vsel %vm871_vm1, %v878_v62, %v880_v11  ;;  %v885_v63 = vrot.slane %v4231_v6, 2  ;;  %v3657_v10 = vpack.c.bf16 %v2609_v45, %v2608_v50  ;;  %v2546_v62 = vld [vmem:[%s5014_s3 + $0x120] sm:$0xff]  ;;  %v2547_v6 = vld [vmem:[%s5014_s3 + $0x128] sm:$0xff]  ;;  %v2613_v45 = vld [vmem:[%s5014_s3 + $0x338] sm:$0xff] }
  0x4d   : > { %3648 = vmatpush3.bf16.msra.mxu0 %v3645_v12  ;;  %3010 = vmatprep.mubr.f32.mxu1 %v4465_v9  ;;  %v2544_v12 = vld [vmem:[%s5014_s3 + $0x110] sm:$0xff]  ;;  %v2611_v11 = vld [vmem:[%s5014_s3 + $0x328] sm:$0xff] }
  0x4e   : > { %3234 = vmatprep.mubr.f32.mxu0 %v4506_v52  ;;  %3522 = vmatprep.subr.bf16.mxu1 %v3521_v37  ;;  %v4575_v44 = vsel %vm871_vm1, %v883_v61, %v885_v63  ;;  %v2548_v61 = vld [vmem:[%s5014_s3 + $0x130] sm:$0xff] }
  0x4f   : > { %3011 = vmatmul.mubr.f32.gmra.mrb[14].mxu1 %v4500_v47  ;;  %3650 = vmatprep.subr.bf16.mxu0 %v3649_v54 }
  0x50   : > { %3235 = vmatmul.mubr.f32.gmra.mrb[14].mxu0 %v4526_v24  ;;  %3524 = vmatpush3.bf16.msra.mxu1 %v3521_v37  ;;  %v3529_v37 = vpack.c.bf16 %v2545_v17, %v2544_v12  ;;  %v890_v12 = vrot.slane %v4262_v19, 2  ;;  %v2549_v19 = vld [vmem:[%s5014_s3 + $0x138] sm:$0xff] }
  0x51   : > { %3652 = vmatpush3.bf16.msra.mxu0 %v3649_v54  ;;  %3045 = vmatprep.mubr.f32.mxu1 %v4131_v28  ;;  %v887_v54 = vrot.slane %v4252_v14, 2  ;;  %v888_v28 = vrot.slane %v4255_v15, 2 }
  0x52   : > { %3269 = vmatprep.mubr.f32.mxu0 %v4531_v26  ;;  %3526 = vmatprep.subr.bf16.mxu1 %v3525_v8 }
  0x53   : > { %3046 = vmatmul.mubr.f32.vlgmr.msra.gmra.mrb[0].mxu1 %v4140_v29  ;;  %3654 = vmatprep.subr.bf16.mxu0 %v3653_v39  ;;  %v2610_v29 = vld [vmem:[%s5014_s3 + $0x320] sm:$0xff]  ;;  %v4581_v17 = vsel %vm871_vm1, %v887_v54, %v888_v28  ;;  %v4600_v63 = vsel %vm871_vm1, %v888_v28, %v890_v12  ;;  %v895_v54 = vrot.slane %v4300_v38, 2  ;;  %v2551_v38 = vld [vmem:[%s5014_s3 + $0x148] sm:$0xff] }
  0x54   : > { %3270 = vmatmul.mubr.f32.vlgmr.msra.gmra.mrb[0].mxu0 %v4550_v41  ;;  %3528 = vmatpush3.bf16.msra.mxu1 %v3525_v8  ;;  %v3533_v8 = vpack.c.bf16 %v2547_v6, %v2546_v62  ;;  %v3661_v50 = vpack.c.bf16 %v2611_v11, %v2610_v29  ;;  %v898_v29 = vrot.slane %v4326_v49, 2  ;;  %v2550_v28 = vld [vmem:[%s5014_s3 + $0x140] sm:$0xff]  ;;  %v2615_v12 = vld [vmem:[%s5014_s3 + $0x348] sm:$0xff] }
  0x55   : > { %3656 = vmatpush3.bf16.msra.mxu0 %v3653_v39  ;;  %3048 = vmatprep.mubr.f32.mxu1 %v4144_v31  ;;  %v892_v39 = vrot.slane %v4287_v30, 2  ;;  %v893_v31 = vrot.slane %v4290_v33, 2  ;;  %v2614_v11 = vld [vmem:[%s5014_s3 + $0x340] sm:$0xff] }
  0x56   : > { %3272 = vmatprep.mubr.f32.mxu0 %v4556_v4  ;;  %3530 = vmatprep.subr.bf16.mxu1 %v3529_v37 }
  0x57   : > { %3049 = vmatmul.mubr.f32.gmra.mrb[2].mxu1 %v4147_v32  ;;  %3658 = vmatprep.subr.bf16.mxu0 %v3657_v10  ;;  %v2612_v32 = vld [vmem:[%s5014_s3 + $0x330] sm:$0xff]  ;;  %v4606_v62 = vsel %vm871_vm1, %v892_v39, %v893_v31  ;;  %v4625_v39 = vsel %vm871_vm1, %v893_v31, %v895_v54 }
  0x58   : > { %3273 = vmatmul.mubr.f32.gmra.mrb[2].mxu0 %v4575_v44  ;;  %3532 = vmatpush3.bf16.msra.mxu1 %v3529_v37  ;;  %v3537_v37 = vpack.c.bf16 %v2549_v19, %v2548_v61  ;;  %v3665_v6 = vpack.c.bf16 %v2613_v45, %v2612_v32  ;;  %v900_v61 = vrot.slane %v4339_v55, 2  ;;  %v3669_v32 = vpack.c.bf16 %v2615_v12, %v2614_v11  ;;  %v2552_v31 = vld [vmem:[%s5014_s3 + $0x150] sm:$0xff]  ;;  %v2553_v55 = vld [vmem:[%s5014_s3 + $0x158] sm:$0xff] }
  0x59   : > { %3660 = vmatpush3.bf16.msra.mxu0 %v3657_v10  ;;  %3051 = vmatprep.mubr.f32.mxu1 %v4224_v1  ;;  %v897_v10 = vrot.slane %v4323_v48, 2  ;;  %v903_v45 = vrot.slane %v4360_v3, 2  ;;  %v2616_v54 = vld [vmem:[%s5014_s3 + $0x350] sm:$0xff] }
  0x5a   : > { %3275 = vmatprep.mubr.f32.mxu0 %v4581_v17  ;;  %3534 = vmatprep.subr.bf16.mxu1 %v3533_v8 }
  0x5b   : > { %3052 = vmatmul.mubr.f32.gmra.mrb[4].mxu1 %v4227_v2  ;;  %3662 = vmatprep.subr.bf16.mxu0 %v3661_v50  ;;  %v4631_v19 = vsel %vm871_vm1, %v897_v10, %v898_v29  ;;  %v2617_v10 = vld [vmem:[%s5014_s3 + $0x358] sm:$0xff] }
  0x5c   : > { %3276 = vmatmul.mubr.f32.gmra.mrb[4].mxu0 %v4600_v63  ;;  %3536 = vmatpush3.bf16.msra.mxu1 %v3533_v8  ;;  %v3541_v8 = vpack.c.bf16 %v2551_v38, %v2550_v28  ;;  %v4650_v28 = vsel %vm871_vm1, %v898_v29, %v900_v61  ;;  %v905_v38 = vrot.slane %v4385_v13, 2  ;;  %v3673_v12 = vpack.c.bf16 %v2617_v10, %v2616_v54  ;;  %v2554_v29 = vld [vmem:[%s5014_s3 + $0x160] sm:$0xff]  ;;  %v2555_v13 = vld [vmem:[%s5014_s3 + $0x168] sm:$0xff] }
  0x5d   : > { %3664 = vmatpush3.bf16.msra.mxu0 %v3661_v50  ;;  %3054 = vmatprep.mubr.f32.mxu1 %v4252_v14  ;;  %v902_v50 = vrot.slane %v4357_v0, 2  ;;  %v2618_v61 = vld [vmem:[%s5014_s3 + $0x360] sm:$0xff] }
  0x5e   : > { %3278 = vmatprep.mubr.f32.mxu0 %v4606_v62  ;;  %3538 = vmatprep.subr.bf16.mxu1 %v3537_v37 }
  0x5f   : > { %3055 = vmatmul.mubr.f32.gmra.mrb[6].mxu1 %v4255_v15  ;;  %3666 = vmatprep.subr.bf16.mxu0 %v3665_v6  ;;  %v4656_v11 = vsel %vm871_vm1, %v902_v50, %v903_v45  ;;  %v2619_v50 = vld [vmem:[%s5014_s3 + $0x368] sm:$0xff] }
  0x60   : > { %3279 = vmatmul.mubr.f32.gmra.mrb[6].mxu0 %v4625_v39  ;;  %3540 = vmatpush3.bf16.msra.mxu1 %v3537_v37  ;;  %v3545_v37 = vpack.c.bf16 %v2553_v55, %v2552_v31  ;;  %v4675_v31 = vsel %vm871_vm1, %v903_v45, %v905_v38  ;;  %v910_v55 = vrot.slane %v4434_v42, 2  ;;  %v3677_v10 = vpack.c.bf16 %v2619_v50, %v2618_v61  ;;  %v2556_v45 = vld [vmem:[%s5014_s3 + $0x170] sm:$0xff]  ;;  %v2557_v42 = vld [vmem:[%s5014_s3 + $0x178] sm:$0xff] }
  0x61   : > { %3668 = vmatpush3.bf16.msra.mxu0 %v3665_v6  ;;  %3057 = vmatprep.mubr.f32.mxu1 %v4287_v30  ;;  %v907_v6 = vrot.slane %v4396_v21, 2  ;;  %v2620_v38 = vld [vmem:[%s5014_s3 + $0x370] sm:$0xff] }
  0x62   : > { %3281 = vmatprep.mubr.f32.mxu0 %v4631_v19  ;;  %3542 = vmatprep.subr.bf16.mxu1 %v3541_v8 }
  0x63   : > { %3058 = vmatmul.mubr.f32.gmra.mrb[8].mxu1 %v4290_v33  ;;  %3670 = vmatprep.subr.bf16.mxu0 %v3669_v32  ;;  %v4681_v54 = vsel %vm871_vm1, %v907_v6, %v908_v46  ;;  %v2621_v6 = vld [vmem:[%s5014_s3 + $0x378] sm:$0xff] }
  0x64   : > { %3282 = vmatmul.mubr.f32.gmra.mrb[8].mxu0 %v4650_v28  ;;  %3544 = vmatpush3.bf16.msra.mxu1 %v3541_v8  ;;  %v3549_v8 = vpack.c.bf16 %v2555_v13, %v2554_v29  ;;  %v4700_v29 = vsel %vm871_vm1, %v908_v46, %v910_v55  ;;  %v1475_v13 = vrot.slane %v4468_v18, 2  ;;  %v3681_v50 = vpack.c.bf16 %v2621_v6, %v2620_v38  ;;  %v2559_v46 = vld [vmem:[%s5014_s3 + $0x188] sm:$0xff]  ;;  %v2622_v18 = vld [vmem:[%s5014_s3 + $0x380] sm:$0xff]  ;;  %v2625_v38 = vld [vmem:[%s5014_s3 + $0x398] sm:$0xff] }
  0x65   : > { %3672 = vmatpush3.bf16.msra.mxu0 %v3669_v32  ;;  %3060 = vmatprep.mubr.f32.mxu1 %v4323_v48  ;;  %v1472_v32 = vrot.slane %v4451_v59, 2  ;;  %v2623_v55 = vld [vmem:[%s5014_s3 + $0x388] sm:$0xff] }
  0x66   : > { %3284 = vmatprep.mubr.f32.mxu0 %v4656_v11  ;;  %3546 = vmatprep.subr.bf16.mxu1 %v3545_v37 }
  0x67   : > { %3061 = vmatmul.mubr.f32.gmra.mrb[10].mxu1 %v4326_v49  ;;  %3674 = vmatprep.subr.bf16.mxu0 %v3673_v12  ;;  %v4706_v61 = vsel %vm871_vm1, %v1472_v32, %v1473_v35  ;;  %v4723_v32 = vsel %vm871_vm1, %v1473_v35, %v1475_v13  ;;  %v2624_v35 = vld [vmem:[%s5014_s3 + $0x390] sm:$0xff] }
  0x68   : > { %3285 = vmatmul.mubr.f32.gmra.mrb[10].mxu0 %v4675_v31  ;;  %3548 = vmatpush3.bf16.msra.mxu1 %v3545_v37  ;;  %v3553_v37 = vpack.c.bf16 %v2557_v42, %v2556_v45  ;;  %v2560_v42 = vld [vmem:[%s5014_s3 + $0x190] sm:$0xff]  ;;  %v3689_v13 = vpack.c.bf16 %v2625_v38, %v2624_v35  ;;  %v2630_v35 = vld [vmem:[%s5014_s3 + $0x3c0] sm:$0xff]  ;;  %v2631_v38 = vld [vmem:[%s5014_s3 + $0x3c8] sm:$0xff] }
  0x69   : > { %3676 = vmatpush3.bf16.msra.mxu0 %v3673_v12  ;;  %3063 = vmatprep.mubr.f32.mxu1 %v4357_v0  ;;  %v2558_v12 = vld [vmem:[%s5014_s3 + $0x180] sm:$0xff] }
  0x6a   : > { %3287 = vmatprep.mubr.f32.mxu0 %v4681_v54  ;;  %3550 = vmatprep.subr.bf16.mxu1 %v3549_v8  ;;  %v3557_v45 = vpack.c.bf16 %v2559_v46, %v2558_v12  ;;  %v2563_v12 = vld [vmem:[%s5014_s3 + $0x1a8] sm:$0xff] }
  0x6b   : > { %3064 = vmatmul.mubr.f32.gmra.mrb[12].mxu1 %v4360_v3  ;;  %3678 = vmatprep.subr.bf16.mxu0 %v3677_v10 }
  0x6c   : > { %3288 = vmatmul.mubr.f32.gmra.mrb[12].mxu0 %v4700_v29  ;;  %3552 = vmatpush3.bf16.msra.mxu1 %v3549_v8  ;;  %v3685_v8 = vpack.c.bf16 %v2623_v55, %v2622_v18  ;;  %v2564_v18 = vld [vmem:[%s5014_s3 + $0x1b0] sm:$0xff]  ;;  %v2565_v55 = vld [vmem:[%s5014_s3 + $0x1b8] sm:$0xff] }
  0x6d   : > { %3680 = vmatpush3.bf16.msra.mxu0 %v3677_v10  ;;  %3066 = vmatprep.mubr.f32.mxu1 %v4396_v21  ;;  %v2561_v10 = vld [vmem:[%s5014_s3 + $0x198] sm:$0xff] }
  0x6e   : > { %3290 = vmatprep.mubr.f32.mxu0 %v4706_v61  ;;  %3554 = vmatprep.subr.bf16.mxu1 %v3553_v37  ;;  %v3561_v6 = vpack.c.bf16 %v2561_v10, %v2560_v42  ;;  %v2566_v42 = vld [vmem:[%s5014_s3 + $0x1c0] sm:$0xff]  ;;  %v2567_v10 = vld [vmem:[%s5014_s3 + $0x1c8] sm:$0xff] }
  0x6f   : > { %3067 = vmatmul.mubr.f32.gmra.mrb[14].mxu1 %v4399_v22  ;;  %3682 = vmatprep.subr.bf16.mxu0 %v3681_v50 }
  0x70   : > { %3291 = vmatmul.mubr.f32.gmra.mrb[14].mxu0 %v4723_v32  ;;  %3556 = vmatpush3.bf16.msra.mxu1 %v3553_v37  ;;  %v2562_v37 = vld [vmem:[%s5014_s3 + $0x1a0] sm:$0xff] }
  0x71   : > { %3684 = vmatpush3.bf16.msra.mxu0 %v3681_v50  ;;  %3101 = vmatprep.mubr.f32.mxu1 %v4342_v56  ;;  %v2626_v56 = vld [vmem:[%s5014_s3 + $0x3a0] sm:$0xff]  ;;  %v3565_v50 = vpack.c.bf16 %v2563_v12, %v2562_v37  ;;  %v2568_v37 = vld [vmem:[%s5014_s3 + $0x1d0] sm:$0xff]  ;;  %v2569_v12 = vld [vmem:[%s5014_s3 + $0x1d8] sm:$0xff] }
  0x72   : > { %3325 = vmatprep.mubr.f32.mxu0 %v4224_v1  ;;  %3558 = vmatprep.subr.bf16.mxu1 %v3557_v45 }
  0x73   : > { %3102 = vmatmul.mubr.f32.vlgmr.msra.gmra.mrb[0].mxu1 %v4345_v57  ;;  %3686 = vmatprep.subr.bf16.mxu0 %v3685_v8  ;;  %v2627_v57 = vld [vmem:[%s5014_s3 + $0x3a8] sm:$0xff] }
  0x74   : > { %3326 = vmatmul.mubr.f32.vlgmr.msra.gmra.mrb[0].mxu0 %v4227_v2  ;;  %3560 = vmatpush3.bf16.msra.mxu1 %v3557_v45  ;;  %v3693_v46 = vpack.c.bf16 %v2627_v57, %v2626_v56  ;;  %v3569_v45 = vpack.c.bf16 %v2565_v55, %v2564_v18  ;;  %v2632_v56 = vld [vmem:[%s5014_s3 + $0x3d0] sm:$0xff]  ;;  %v2633_v57 = vld [vmem:[%s5014_s3 + $0x3d8] sm:$0xff]  ;;  %v2570_v18 = vld [vmem:[%s5014_s3 + $0x1e0] sm:$0xff] }
  0x75   : > { %3688 = vmatpush3.bf16.msra.mxu0 %v3685_v8  ;;  %3104 = vmatprep.mubr.f32.mxu1 %v4531_v26  ;;  %v2628_v26 = vld [vmem:[%s5014_s3 + $0x3b0] sm:$0xff]  ;;  %v2571_v55 = vld [vmem:[%s5014_s3 + $0x1e8] sm:$0xff] }
  0x76   : > { %3328 = vmatprep.mubr.f32.mxu0 %v4252_v14  ;;  %3562 = vmatprep.subr.bf16.mxu1 %v3561_v6 }
  0x77   : > { %3105 = vmatmul.mubr.f32.gmra.mrb[2].mxu1 %v4550_v41  ;;  %3690 = vmatprep.subr.bf16.mxu0 %v3689_v13  ;;  %v2629_v41 = vld [vmem:[%s5014_s3 + $0x3b8] sm:$0xff] }
  0x78   : > { %3329 = vmatmul.mubr.f32.gmra.mrb[2].mxu0 %v4255_v15  ;;  %3564 = vmatpush3.bf16.msra.mxu1 %v3561_v6  ;;  %v3697_v8 = vpack.c.bf16 %v2629_v41, %v2628_v26  ;;  %v3573_v6 = vpack.c.bf16 %v2567_v10, %v2566_v42  ;;  %v2634_v26 = vld [vmem:[%s5014_s3 + $0x3e0] sm:$0xff]  ;;  %v2635_v41 = vld [vmem:[%s5014_s3 + $0x3e8] sm:$0xff]  ;;  %v2572_v42 = vld [vmem:[%s5014_s3 + $0x1f0] sm:$0xff] }
  0x79   : > { %3692 = vmatpush3.bf16.msra.mxu0 %v3689_v13  ;;  %3107 = vmatprep.mubr.f32.mxu1 %v4556_v4  ;;  %v3701_v13 = vpack.c.bf16 %v2631_v38, %v2630_v35  ;;  %v2573_v10 = vld [vmem:[%s5014_s3 + $0x1f8] sm:$0xff]  ;;  %v2636_v35 = vld [vmem:[%s5014_s3 + $0x3f0] sm:$0xff] }
  0x7a   : > { %3331 = vmatprep.mubr.f32.mxu0 %v4287_v30  ;;  %3566 = vmatprep.subr.bf16.mxu1 %v3565_v50  ;;  %v2637_v38 = vld [vmem:[%s5014_s3 + $0x3f8] sm:$0xff] }
  0x7b   : > { %3108 = vmatmul.mubr.f32.gmra.mrb[4].mxu1 %v4575_v44  ;;  %3694 = vmatprep.subr.bf16.mxu0 %v3693_v46 }
  0x7c   : > { %3332 = vmatmul.mubr.f32.gmra.mrb[4].mxu0 %v4290_v33  ;;  %3568 = vmatpush3.bf16.msra.mxu1 %v3565_v50  ;;  %v3577_v50 = vpack.c.bf16 %v2569_v12, %v2568_v37  ;;  %v2638_v37 = vld [vmem:[%s5014_s3 + $0x400] sm:$0xff]  ;;  %v2639_v12 = vld [vmem:[%s5014_s3 + $0x408] sm:$0xff] }
  0x7d   : > { %3696 = vmatpush3.bf16.msra.mxu0 %v3693_v46  ;;  %3110 = vmatprep.mubr.f32.mxu1 %v4581_v17  ;;  %v3705_v46 = vpack.c.bf16 %v2633_v57, %v2632_v56  ;;  %v3717_v56 = vpack.c.bf16 %v2639_v12, %v2638_v37  ;;  %v2640_v57 = vld [vmem:[%s5014_s3 + $0x410] sm:$0xff] }
  0x7e   : > { %3334 = vmatprep.mubr.f32.mxu0 %v4323_v48  ;;  %3570 = vmatprep.subr.bf16.mxu1 %v3569_v45 }
  0x7f   : > { %3111 = vmatmul.mubr.f32.gmra.mrb[6].mxu1 %v4600_v63  ;;  %3698 = vmatprep.subr.bf16.mxu0 %v3697_v8 }
  0x80   : > { %3335 = vmatmul.mubr.f32.gmra.mrb[6].mxu0 %v4326_v49  ;;  %3572 = vmatpush3.bf16.msra.mxu1 %v3569_v45  ;;  %v3581_v45 = vpack.c.bf16 %v2571_v55, %v2570_v18  ;;  %v3938_v18 = vld [vmem:[%s4122_s29 + $0x20] sm:$0xff] }
  0x81   : > { %3700 = vmatpush3.bf16.msra.mxu0 %v3697_v8  ;;  %3113 = vmatprep.mubr.f32.mxu1 %v4606_v62  ;;  %v3709_v8 = vpack.c.bf16 %v2635_v41, %v2634_v26  ;;  %v2642_v55 = vld [vmem:[%s5014_s3 + $0x420] sm:$0xff]  ;;  %v2643_v26 = vld [vmem:[%s5014_s3 + $0x428] sm:$0xff]  ;;  %v2645_v41 = vld [vmem:[%s5014_s3 + $0x438] sm:$0xff] }
  0x82   : > { %3337 = vmatprep.mubr.f32.mxu0 %v4357_v0  ;;  %3574 = vmatprep.subr.bf16.mxu1 %v3573_v6 }
  0x83   : > { %3114 = vmatmul.mubr.f32.gmra.mrb[8].mxu1 %v4625_v39  ;;  %3702 = vmatprep.subr.bf16.mxu0 %v3701_v13 }
  0x84   : > { %3338 = vmatmul.mubr.f32.gmra.mrb[8].mxu0 %v4360_v3  ;;  %3576 = vmatpush3.bf16.msra.mxu1 %v3573_v6  ;;  %v3585_v6 = vpack.c.bf16 %v2573_v10, %v2572_v42 }
  0x85   : > { %3704 = vmatpush3.bf16.msra.mxu0 %v3701_v13  ;;  %3116 = vmatprep.mubr.f32.mxu1 %v4631_v19  ;;  %v3713_v13 = vpack.c.bf16 %v2637_v38, %v2636_v35 }
  0x86   : > { %3340 = vmatprep.mubr.f32.mxu0 %v4396_v21  ;;  %3578 = vmatprep.subr.bf16.mxu1 %v3577_v50 }
  0x87   : > { %3117 = vmatmul.mubr.f32.gmra.mrb[10].mxu1 %v4650_v28  ;;  %3706 = vmatprep.subr.bf16.mxu0 %v3705_v46 }
  0x88   : > { %3341 = vmatmul.mubr.f32.gmra.mrb[10].mxu0 %v4399_v22  ;;  %3580 = vmatpush3.bf16.msra.mxu1 %v3577_v50  ;;  %v2641_v50 = vld [vmem:[%s5014_s3 + $0x418] sm:$0xff] }
  0x89   : > { %3708 = vmatpush3.bf16.msra.mxu0 %v3705_v46  ;;  %3119 = vmatprep.mubr.f32.mxu1 %v4656_v11  ;;  %v3937_v46 = vld [vmem:[%s4122_s29 + $0x18] sm:$0xff]  ;;  %s436_s29 = scalar_lea.vmem %s5017_s6, %s2523_s14 }
  0x8a   : > { %3343 = vmatprep.mubr.f32.mxu0 %v4451_v59  ;;  %3582 = vmatprep.subr.bf16.mxu1 %v3581_v45 }
  0x8b   : > { %3120 = vmatmul.mubr.f32.gmra.mrb[12].mxu1 %v4675_v31  ;;  %3710 = vmatprep.subr.bf16.mxu0 %v3709_v8 }
  0x8c   : > { %3344 = vmatmul.mubr.f32.gmra.mrb[12].mxu0 %v4454_v60  ;;  %3584 = vmatpush3.bf16.msra.mxu1 %v3581_v45 }
  0x8d   : > { %3712 = vmatpush3.bf16.msra.mxu0 %v3709_v8  ;;  %3122 = vmatprep.mubr.f32.mxu1 %v4681_v54 }
  0x8e   : > { %3346 = vmatprep.mubr.f32.mxu0 %v4436_v43  ;;  %3586 = vmatprep.subr.bf16.mxu1 %v3585_v6  ;;  %v3721_v43 = vpack.c.bf16 %v2641_v50, %v2640_v57 }
  0x8f   : > { %3123 = vmatmul.mubr.f32.gmra.mrb[14].mxu1 %v4700_v29  ;;  %3714 = vmatprep.subr.bf16.mxu0 %v3713_v13 }
  0x90   : > { %3347 = vmatmul.mubr.f32.gmra.mrb[14].mxu0 %v4447_v53  ;;  %3588 = vmatpush3.bf16.msra.mxu1 %v3585_v6  ;;  %v2644_v53 = vld [vmem:[%s5014_s3 + $0x430] sm:$0xff] }
  0x91   : > { %3716 = vmatpush3.bf16.msra.mxu0 %v3713_v13  ;;  %3157 = vmatprep.mubr.f32.mxu1 %v3937_v46 }
  0x92   : > { %3381 = vmatprep.mubr.f32.mxu0 %v4265_v20  ;;  %3718 = vmatprep.subr.bf16.mxu0 %v3717_v56  ;;  %v3725_v20 = vpack.c.bf16 %v2643_v26, %v2642_v55 }
  0x93   : > { %3158 = vmatmul.mubr.f32.vlgmr.msra.gmra.mrb[0].mxu1 %v3938_v18  ;;  %3749 = vmatprep.subr.bf16.mxu1 %v3717_v56 }
  0x94   : > { %3382 = vmatmul.mubr.f32.vlgmr.msra.gmra.mrb[0].mxu0 %v4294_v34  ;;  %3757 = vmatpush3.bf16.msra.mxu1 %v3717_v56  ;;  %v2647_v34 = vld [vmem:[%s5014_s3 + $0x448] sm:$0xff] }
  0x95   : > { %3720 = vmatpush3.bf16.msra.mxu0 %v3717_v56  ;;  %3160 = vmatprep.mubr.f32.mxu1 %v4224_v1  ;;  %v3729_v1 = vpack.c.bf16 %v2645_v41, %v2644_v53 }
  0x96   : > { %3384 = vmatprep.mubr.f32.mxu0 %v4304_v40  ;;  %3722 = vmatprep.subr.bf16.mxu0 %v3721_v43  ;;  %v2649_v40 = vld [vmem:[%s5014_s3 + $0x458] sm:$0xff] }
  0x97   : > { %3161 = vmatmul.mubr.f32.gmra.mrb[2].mxu1 %v4227_v2  ;;  %3750 = vmatprep.subr.bf16.mxu1 %v3721_v43  ;;  %v2646_v2 = vld [vmem:[%s5014_s3 + $0x440] sm:$0xff] }
  0x98   : > { %3385 = vmatmul.mubr.f32.gmra.mrb[2].mxu0 %v4331_v51  ;;  %3758 = vmatpush3.bf16.msra.mxu1 %v3721_v43  ;;  %v2651_v51 = vld [vmem:[%s5014_s3 + $0x468] sm:$0xff] }
  0x99   : > { %3724 = vmatpush3.bf16.msra.mxu0 %v3721_v43  ;;  %3163 = vmatprep.mubr.f32.mxu1 %v4252_v14  ;;  %v3733_v14 = vpack.c.bf16 %v2647_v34, %v2646_v2 }
  0x9a   : > { %3387 = vmatprep.mubr.f32.mxu0 %v4349_v58  ;;  %3726 = vmatprep.subr.bf16.mxu0 %v3725_v20  ;;  %v2653_v58 = vld [vmem:[%s5014_s3 + $0x478] sm:$0xff] }
  0x9b   : > { %3164 = vmatmul.mubr.f32.gmra.mrb[4].mxu1 %v4255_v15  ;;  %3751 = vmatprep.subr.bf16.mxu1 %v3725_v20  ;;  %v2648_v15 = vld [vmem:[%s5014_s3 + $0x450] sm:$0xff] }
  0x9c   : > { %3388 = vmatmul.mubr.f32.gmra.mrb[4].mxu0 %v4375_v7  ;;  %3759 = vmatpush3.bf16.msra.mxu1 %v3725_v20  ;;  %v5022_v7 = vld [vmem:[#allocation3_spill] sm:$0xff] }
  0x9d   : > { %3728 = vmatpush3.bf16.msra.mxu0 %v3725_v20  ;;  %3166 = vmatprep.mubr.f32.mxu1 %v4287_v30  ;;  %v3737_v30 = vpack.c.bf16 %v2649_v40, %v2648_v15 }
  0x9e   : > { %3390 = vmatprep.mubr.f32.mxu0 %v4390_v16  ;;  %3730 = vmatprep.subr.bf16.mxu0 %v3729_v1 }
  0x9f   : > { %3167 = vmatmul.mubr.f32.gmra.mrb[6].mxu1 %v4290_v33  ;;  %3752 = vmatprep.subr.bf16.mxu1 %v3729_v1  ;;  %v2650_v33 = vld [vmem:[%s5014_s3 + $0x460] sm:$0xff] }
  0xa0   : > { %3391 = vmatmul.mubr.f32.gmra.mrb[6].mxu0 %v4413_v25  ;;  %3760 = vmatpush3.bf16.msra.mxu1 %v3729_v1 }
  0xa1   : > { %3732 = vmatpush3.bf16.msra.mxu0 %v3729_v1  ;;  %3169 = vmatprep.mubr.f32.mxu1 %v4323_v48  ;;  %v3741_v48 = vpack.c.bf16 %v2651_v51, %v2650_v33 }
  0xa2   : > { %3393 = vmatprep.mubr.f32.mxu0 %v4429_v36  ;;  %3734 = vmatprep.subr.bf16.mxu0 %v3733_v14 }
  0xa3   : > { %3170 = vmatmul.mubr.f32.gmra.mrb[8].mxu1 %v4326_v49  ;;  %3753 = vmatprep.subr.bf16.mxu1 %v3733_v14  ;;  %v2652_v49 = vld [vmem:[%s5014_s3 + $0x470] sm:$0xff] }
  0xa4   : > { %3394 = vmatmul.mubr.f32.gmra.mrb[8].mxu0 %v4460_v5  ;;  %3761 = vmatpush3.bf16.msra.mxu1 %v3733_v14 }
  0xa5   : > { %3736 = vmatpush3.bf16.msra.mxu0 %v3733_v14  ;;  %3172 = vmatprep.mubr.f32.mxu1 %v4357_v0  ;;  %v3745_v0 = vpack.c.bf16 %v2653_v58, %v2652_v49 }
  0xa6   : > { %3396 = vmatprep.mubr.f32.mxu0 %v4465_v9  ;;  %3738 = vmatprep.subr.bf16.mxu0 %v3737_v30 }
  0xa7   : > { %3173 = vmatmul.mubr.f32.gmra.mrb[10].mxu1 %v4360_v3  ;;  %3754 = vmatprep.subr.bf16.mxu1 %v3737_v30  ;;  %v5021_v3 = vld [vmem:[#allocation2_spill] sm:$0xff] }
  0xa8   : > { %3397 = vmatmul.mubr.f32.gmra.mrb[10].mxu0 %v4500_v47  ;;  %3762 = vmatpush3.bf16.msra.mxu1 %v3737_v30 }
  0xa9   : > { %3740 = vmatpush3.bf16.msra.mxu0 %v3737_v30  ;;  %3175 = vmatprep.mubr.f32.mxu1 %v4396_v21 }
  0xaa   : > { %3399 = vmatprep.mubr.f32.mxu0 %v4506_v52  ;;  %3742 = vmatprep.subr.bf16.mxu0 %v3741_v48 }
  0xab   : > { %3176 = vmatmul.mubr.f32.gmra.mrb[12].mxu1 %v4399_v22  ;;  %3755 = vmatprep.subr.bf16.mxu1 %v3741_v48 }
  0xac   : > { %3400 = vmatmul.mubr.f32.gmra.mrb[12].mxu0 %v4526_v24  ;;  %3763 = vmatpush3.bf16.msra.mxu1 %v3741_v48 }
  0xad   : > { %3744 = vmatpush3.bf16.msra.mxu0 %v3741_v48  ;;  %3178 = vmatprep.mubr.f32.mxu1 %v4451_v59 }
  0xae   : > { %3402 = vmatprep.mubr.f32.mxu0 %v4471_v23  ;;  %3746 = vmatprep.subr.bf16.mxu0 %v3745_v0 }
  0xaf   : > { %3179 = vmatmul.mubr.f32.gmra.mrb[14].mxu1 %v4454_v60  ;;  %3756 = vmatprep.subr.bf16.mxu1 %v3745_v0 }
  0xb0   : > { %3403 = vmatmul.mubr.f32.gmra.mrb[14].mxu0 %v4483_v27  ;;  %3764 = vmatpush3.bf16.msra.mxu1 %v3745_v0 }
  0xb1   : > { %3748 = vmatpush3.bf16.msra.mxu0 %v3745_v0  ;;  %3437 = vmatprep.mubr.f32.mxu0 %v4556_v4 }
  0xb2   : > { %3449 = vmatprep.mubr.f32.mxu1 %v4656_v11 }
  0xb3   : > { %3450 = vmatmul.mubr.f32.vlgmr.msra.gmra.mrb[16].mxu1 %v4675_v31 }
  0xb4   : > { %3438 = vmatmul.mubr.f32.vlgmr.msra.gmra.mrb[0].mxu0 %v4575_v44  ;;  %3452 = vmatprep.mubr.f32.mxu1 %v4681_v54 }
  0xb5   : > { %3440 = vmatprep.mubr.f32.mxu0 %v4581_v17 }
  0xb7   : > { %3453 = vmatmul.mubr.f32.gmra.mrb[18].mxu1 %v4700_v29 }
  0xb8   : > { %3441 = vmatmul.mubr.f32.gmra.mrb[2].mxu0 %v4600_v63  ;;  %3455 = vmatprep.mubr.f32.mxu1 %v4706_v61 }
  0xb9   : > { %3443 = vmatprep.mubr.f32.mxu0 %v4606_v62 }
  0xbb   : > { %3456 = vmatmul.mubr.f32.gmra.mrb[20].mxu1 %v4723_v32 }
  0xbc   : > { %3444 = vmatmul.mubr.f32.gmra.mrb[4].mxu0 %v4625_v39  ;;  %3458 = vmatprep.mubr.f32.mxu1 %v5021_v3 }
  0xbd   : > { %3446 = vmatprep.mubr.f32.mxu0 %v4631_v19 }
  0xbf   : > { %3459 = vmatmul.mubr.f32.gmra.mrb[22].mxu1 %v5022_v7 }
  0xc0   : > { %3447 = vmatmul.mubr.f32.gmra.mrb[6].mxu0 %v4650_v28 }
 0x166   : > { %v3159_v16 = vpop.f32.mrb[0].mxu1 }
 0x167   : > { %v1189_v21 = vpop.f32.mrb[1].mxu1 }
 0x16a   : > { %v3162_v22 = vpop.f32.mrb[2].mxu1 }
 0x16b   : > { %v1199_v25 = vpop.f32.mrb[3].mxu1 }
 0x16e   : > { %v4940_v36 = vpop.f32.mrb[4].mxu1 }
 0x16f   : > { %v4942_v59 = vpop.f32.mrb[5].mxu1 }
 0x172   : > { %v4944_v60 = vpop.f32.mrb[6].mxu1 }
 0x173   : > { %v4946_v5 = vpop.f32.mrb[7].mxu1 }
 0x176   : > { %v3171_v9 = vpop.f32.mrb[8].mxu1 }
 0x177   : > { %v3395_v23 = vpop.f32.mrb[8].mxu0  ;;  %v1229_v27 = vpop.f32.mrb[9].mxu1 }
 0x178   : > { %v3773_v47 = vadd.f32 %v3395_v23, %v3171_v9  ;;  %v1968_v52 = vpop.f32.mrb[9].mxu0 }
 0x179   : > { %v3775_v24 = vadd.f32 %v1968_v52, %v1229_v27 }
 0x17a   : > { %v3174_v4 = vpop.f32.mrb[10].mxu1 }
 0x17b   : > { %v3398_v44 = vpop.f32.mrb[10].mxu0  ;;  %v1239_v17 = vpop.f32.mrb[11].mxu1 }
 0x17c   : > { %v3777_v63 = vadd.f32 %v3398_v44, %v3174_v4  ;;  %v1978_v62 = vpop.f32.mrb[11].mxu0 }
 0x17d   : > { %v3779_v39 = vadd.f32 %v1978_v62, %v1239_v17 }
 0x17e   : > { %v3177_v19 = vpop.f32.mrb[12].mxu1 }
 0x17f   : > { %v3401_v28 = vpop.f32.mrb[12].mxu0  ;;  %v1249_v11 = vpop.f32.mrb[13].mxu1 }
 0x180   : > { %v3781_v31 = vadd.f32 %v3401_v28, %v3177_v19  ;;  %v1988_v54 = vpop.f32.mrb[13].mxu0 }
 0x181   : > { %v3783_v29 = vadd.f32 %v1988_v54, %v1249_v11 }
 0x182   : > { %v3180_v61 = vpop.f32.mrb[14].mxu1 }
 0x183   : > { %v3404_v32 = vpop.f32.mrb[14].mxu0  ;;  %v1259_v45 = vpop.f32.mrb[15].mxu1 }
 0x184   : > { %v3785_v8 = vadd.f32 %v3404_v32, %v3180_v61  ;;  %v1998_v42 = vpop.f32.mrb[15].mxu0 }
 0x185   : > { %v3787_v10 = vadd.f32 %v1998_v42, %v1259_v45 }
 0x186   : > { %v3451_v35 = vpop.f32.mrb[16].mxu1 }
 0x187   : > { %v3439_v38 = vpop.f32.mrb[0].mxu0  ;;  %v4955_v6 = vadd.f32 %v3773_v47, %v3451_v35  ;;  %v2153_v13 = vpop.f32.mrb[17].mxu1 }
 0x188   : > { %v3765_v37 = vadd.f32 %v3439_v38, %v3159_v16  ;;  %v2113_v12 = vpop.f32.mrb[1].mxu0  ;;  %v4957_v56 = vadd.f32 %v3775_v24, %v2153_v13 }
 0x189   : > { %2217 = vst [vmem:[%s4953_s19 + $0x48] sm:$0xff] %v4955_v6  ;;  %v3766_v57 = vadd.f32 %v2113_v12, %v1189_v21 }
 0x18a   : > { %2209 = vst [vmem:[%s4953_s19 + $0x8] sm:$0xff] %v3765_v37  ;;  %v2246_v50 = vmul.f32 %v3765_v37, %v3765_v37  ;;  %2216 = vst [vmem:[%s4953_s19 + $0x40] sm:$0xff] %v4957_v56  ;;  %v3454_v46 = vpop.f32.mrb[18].mxu1 }
 0x18b   : > { %2208 = vst [vmem:[%s4953_s19] sm:$0xff] %v3766_v57  ;;  %v2224_v43 = vadd.f32 %v3766_v57, %v3765_v37  ;;  %v2245_v18 = vmul.f32 %v3766_v57, %v3766_v57  ;;  %v3442_v55 = vpop.f32.mrb[2].mxu0  ;;  %v3778_v26 = vadd.f32 %v3777_v63, %v3454_v46  ;;  %v2163_v20 = vpop.f32.mrb[19].mxu1 }
 0x18c   : > { %v3767_v53 = vadd.f32 %v3442_v55, %v3162_v22  ;;  %v2123_v41 = vpop.f32.mrb[3].mxu0  ;;  %v3780_v1 = vadd.f32 %v3779_v39, %v2163_v20 }
 0x18d   : > { %v2261_v2 = vadd.f32 %v2246_v50, %v2245_v18  ;;  %2219 = vst [vmem:[%s4953_s19 + $0x58] sm:$0xff] %v3778_v26  ;;  %v3768_v34 = vadd.f32 %v2123_v41, %v1199_v25  ;;  %v2256_v42 = vmul.f32 %v3778_v26, %v3778_v26 }
 0x18e   : > { %2211 = vst [vmem:[%s4953_s19 + $0x18] sm:$0xff] %v3767_v53  ;;  %2218 = vst [vmem:[%s4953_s19 + $0x50] sm:$0xff] %v3780_v1  ;;  %v3457_v14 = vpop.f32.mrb[20].mxu1  ;;  %v2248_v0 = vmul.f32 %v3767_v53, %v3767_v53  ;;  %v2255_v32 = vmul.f32 %v3780_v1, %v3780_v1 }
 0x18f   : > { %2210 = vst [vmem:[%s4953_s19 + $0x10] sm:$0xff] %v3768_v34  ;;  %v2225_v15 = vadd.f32 %v3768_v34, %v2224_v43  ;;  %v2247_v40 = vmul.f32 %v3768_v34, %v3768_v34  ;;  %v3445_v30 = vpop.f32.mrb[4].mxu0  ;;  %v3782_v33 = vadd.f32 %v3781_v31, %v3457_v14  ;;  %v2173_v51 = vpop.f32.mrb[21].mxu1 }
 0x190   : > { %v3769_v48 = vadd.f32 %v3445_v30, %v4940_v36  ;;  %v2133_v49 = vpop.f32.mrb[5].mxu0  ;;  %v3784_v58 = vadd.f32 %v3783_v29, %v2173_v51 }
 0x191   : > { %v2262_v3 = vadd.f32 %v2261_v2, %v2247_v40  ;;  %2221 = vst [vmem:[%s4953_s19 + $0x68] sm:$0xff] %v3782_v33  ;;  %v3770_v7 = vadd.f32 %v2133_v49, %v4942_v59  ;;  %v2226_v16 = vadd.f32 %v3767_v53, %v2225_v15  ;;  %v2258_v12 = vmul.f32 %v3782_v33, %v3782_v33 }
 0x192   : > { %2213 = vst [vmem:[%s4953_s19 + $0x28] sm:$0xff] %v3769_v48  ;;  %2220 = vst [vmem:[%s4953_s19 + $0x60] sm:$0xff] %v3784_v58  ;;  %v3460_v21 = vpop.f32.mrb[22].mxu1  ;;  %v2250_v59 = vmul.f32 %v3769_v48, %v3769_v48  ;;  %v2257_v38 = vmul.f32 %v3784_v58, %v3784_v58 }
 0x193   : > { %2212 = vst [vmem:[%s4953_s19 + $0x20] sm:$0xff] %v3770_v7  ;;  %v2227_v22 = vadd.f32 %v3770_v7, %v2226_v16  ;;  %v2249_v25 = vmul.f32 %v3770_v7, %v3770_v7  ;;  %v2263_v9 = vadd.f32 %v2262_v3, %v2248_v0  ;;  %v3448_v36 = vpop.f32.mrb[6].mxu0  ;;  %v3786_v23 = vadd.f32 %v3785_v8, %v3460_v21  ;;  %v2183_v27 = vpop.f32.mrb[23].mxu1 }
 0x194   : > { %v3771_v47 = vadd.f32 %v3448_v36, %v4944_v60  ;;  %v2143_v52 = vpop.f32.mrb[7].mxu0  ;;  %v3788_v24 = vadd.f32 %v3787_v10, %v2183_v27  ;;  %v2253_v60 = vmul.f32 %v4957_v56, %v4957_v56 }
 0x195   : > { %v2264_v4 = vadd.f32 %v2263_v9, %v2249_v25  ;;  %2223 = vst [vmem:[%s4953_s19 + $0x78] sm:$0xff] %v3786_v23  ;;  %v3772_v44 = vadd.f32 %v2143_v52, %v4946_v5  ;;  %v2228_v17 = vadd.f32 %v3769_v48, %v2227_v22  ;;  %v2254_v5 = vmul.f32 %v4955_v6, %v4955_v6 }
 0x196   : > { %2215 = vst [vmem:[%s4953_s19 + $0x38] sm:$0xff] %v3771_v47  ;;  %2222 = vst [vmem:[%s4953_s19 + $0x70] sm:$0xff] %v3788_v24  ;;  %v2252_v19 = vmul.f32 %v3771_v47, %v3771_v47  ;;  %v2259_v46 = vmul.f32 %v3788_v24, %v3788_v24 }
 0x197   : > { %2214 = vst [vmem:[%s4953_s19 + $0x30] sm:$0xff] %v3772_v44  ;;  %v2229_v63 = vadd.f32 %v3772_v44, %v2228_v17  ;;  %v2251_v62 = vmul.f32 %v3772_v44, %v3772_v44  ;;  %v2265_v39 = vadd.f32 %v2264_v4, %v2250_v59 }
 0x199   : > { %v2230_v28 = vadd.f32 %v3771_v47, %v2229_v63  ;;  %v2266_v11 = vadd.f32 %v2265_v39, %v2251_v62 }
 0x19b   : > { %v2231_v31 = vadd.f32 %v4957_v56, %v2230_v28  ;;  %v2267_v54 = vadd.f32 %v2266_v11, %v2252_v19 }
 0x19d   : > { %v2232_v29 = vadd.f32 %v4955_v6, %v2231_v31  ;;  %v2268_v61 = vadd.f32 %v2267_v54, %v2253_v60  ;;  %v2260_v6 = vmul.f32 %v3786_v23, %v3786_v23 }
 0x19f   : > { %v2269_v45 = vadd.f32 %v2268_v61, %v2254_v5  ;;  %v2233_v8 = vadd.f32 %v3780_v1, %v2232_v29 }
 0x1a1   : > { %v2234_v10 = vadd.f32 %v3778_v26, %v2233_v8  ;;  %v2270_v35 = vadd.f32 %v2269_v45, %v2255_v32 }
 0x1a3   : > { %v2235_v13 = vadd.f32 %v3784_v58, %v2234_v10  ;;  %v2271_v37 = vadd.f32 %v2270_v35, %v2256_v42 }
 0x1a5   : > { %v2236_v56 = vadd.f32 %v3782_v33, %v2235_v13  ;;  %v2272_v57 = vadd.f32 %v2271_v37, %v2257_v38 }
 0x1a7   : > { %v2237_v50 = vadd.f32 %v3788_v24, %v2236_v56  ;;  %v2273_v43 = vadd.f32 %v2272_v57, %v2258_v12 }
 0x1a9   : > { %v2238_v18 = vadd.f32 %v3786_v23, %v2237_v50  ;;  %v2274_v55 = vadd.f32 %v2273_v43, %v2259_v46 }
 0x1ab   : > { %v2239_v20 = vrot.slane %v2238_v18, 4  ;;  %v2275_v53 = vadd.f32 %v2274_v55, %v2260_v6 }
 0x1ad   : > { %v2240_v26 = vadd.f32 %v2239_v20, %v2238_v18  ;;  %v2276_v41 = vrot.slane %v2275_v53, 4 }
 0x1af   : > { %v2241_v1 = vrot.slane %v2240_v26, 2  ;;  %v2277_v2 = vadd.f32 %v2276_v41, %v2275_v53 }
 0x1b1   : > { %v2242_v34 = vadd.f32 %v2241_v1, %v2240_v26  ;;  %v2278_v14 = vrot.slane %v2277_v2, 2 }
 0x1b3   : > { %v2243_v15 = vrot.slane %v2242_v34, 1  ;;  %v2279_v40 = vadd.f32 %v2278_v14, %v2277_v2 }
 0x1b5   : > { %v2244_v30 = vadd.f32 %v2243_v15, %v2242_v34  ;;  %v2280_v33 = vrot.slane %v2279_v40, 1 }
 0x1b7   : > { %v2281_v51 = vadd.f32 %v2280_v33, %v2279_v40  ;;  %2282 = vst [vmem:[%s428_s16] sm:$0xff] %v2244_v30 }
 0x1b9   : > { %2283 = vst [vmem:[%s436_s29] sm:$0xff] %v2281_v51 }
 0x1ba PF: > { %s17_s25 = sadd.s32 1, %s3977_s25   ;;  %s5023_s21 = smov %s3969_s23 }
 0x1bb   : > { %p14_p11 = scmp.ge.s32.totalorder %s17_s25, 6   ;;  %s5024_s22 = smov %s3973_s24 }
 0x1bc   : > { %s5025_s23 = smov %s5028_s26  ;;  %s5026_s24 = smov %s5032_s27 }
 0x1bd   :  { %16 = sbr.rel (!%p14_p11) target bundleno = 3 (0x3), region = 104 }

</bundles_post_ra>
